<compile_context>
chip_gen: v7x
topology: tpu7x:2x2x1
jax: 0.10.0
libtpu: 0.0.40
codegen_flags: <defaults>
</compile_context>

<pallas_src>
import functools
import math

import jax
import jax.numpy as jnp
from jax.experimental import pallas as pl
from jax.experimental.pallas import tpu as pltpu

EPS = 1e-12          # matches nn.LayerNorm(size, eps=1e-12) in the module
NEG_INF = -1e30      # plain Python float: must NOT be a jnp constant (kernel capture)


def _layernorm(x, g, b):
    # x: (..., D) f32, g/b: (1, D) f32. Biased variance, matches torch.nn.LayerNorm.
    mean = jnp.mean(x, axis=-1, keepdims=True)
    xc = x - mean
    var = jnp.mean(xc * xc, axis=-1, keepdims=True)
    return xc * jax.lax.rsqrt(var + EPS) * g + b


def _mha(q_in, kv, valid, wq, bq, wo, bo, n_head):
    """Multi-head attention against precomputed (biased) K|V.

    q_in:  (Tq, D)  f32   (already layer-normed query input)
    kv:    (Tk, 2D) bf16  (K|V with bias already applied, hoisted to the wrapper)
    valid: (Tq, Tk) bool, True = attendable
    wq/wo: (D, D) bf16; bq/bo: (1, D) f32.
    """
    D = wq.shape[0]
    dk = D // n_head
    scale = 1.0 / math.sqrt(dk)
    bf16 = jnp.bfloat16

    # Q projection; 1/sqrt(dk) folded into Q (one (Tq,D) multiply).
    q = (jnp.dot(q_in.astype(bf16), wq, preferred_element_type=jnp.float32)
         + bq) * scale                                       # (Tq, D) f32
    k = kv[:, :D]                                            # (Tk, D) bf16
    v = kv[:, D:]                                            # (Tk, D) bf16

    # Static head loop (re-check for vreg spills before converting to fori_loop).
    ctx_heads = []
    for h in range(n_head):
        sl = slice(h * dk, (h + 1) * dk)
        qh = q[:, sl].astype(bf16)
        # NT matmul (contract last dims) — avoids an explicit transpose.
        s = jax.lax.dot_general(qh, k[:, sl], (((1,), (1,)), ((), ())),
                                preferred_element_type=jnp.float32)
        s = jnp.where(valid, s, NEG_INF)
        s = s - jnp.max(s, axis=-1, keepdims=True)
        p = jnp.exp(s)
        p = p / jnp.sum(p, axis=-1, keepdims=True)
        ctx_heads.append(jnp.dot(p.astype(bf16), v[:, sl],
                                 preferred_element_type=jnp.float32))
    # Concatenate heads, then ONE full-width output projection (K = D, not dk).
    ctx = jnp.concatenate(ctx_heads, axis=-1)                # (Tq, D) f32
    return jnp.dot(ctx.astype(bf16), wo, preferred_element_type=jnp.float32) + bo


def _ffn(x_ln, w1_ref, b1_ref, w2_ref, b2_ref):
    """Position-wise FFN, chunked over the hidden dim for large `hidden`."""
    bf16 = jnp.bfloat16
    hid = w1_ref.shape[1]
    d = w1_ref.shape[0]
    chunk = 1024 if (hid > 1024 and hid % 1024 == 0) else hid
    x_bf = x_ln.astype(bf16)
    acc = jnp.zeros((x_ln.shape[0], d), jnp.float32)
    for c0 in range(0, hid, chunk):                          # static slices
        h = jnp.dot(x_bf, w1_ref[:, c0:c0 + chunk],
                    preferred_element_type=jnp.float32) + b1_ref[:, c0:c0 + chunk]
        h = jnp.maximum(h, 0.0)
        acc = acc + jnp.dot(h.astype(bf16), w2_ref[c0:c0 + chunk, :],
                            preferred_element_type=jnp.float32)
    return acc + b2_ref[...]


def _decoder_layer_kernel(
    # scalar prefetch (SMEM)
    tgt_lens_ref, mem_lens_ref,
    # data tiles
    tgt_ref,         # (tq, D)       f32   query/residual slice
    self_kv_ref,     # (T_out_p, 2D) bf16  hoisted self-attn K|V
    cross_kv_ref,    # (T_in,   2D)  bf16  hoisted cross-attn K|V
    # norm1 + self-attn params
    n1g_ref, n1b_ref, s_wq_ref, s_bq_ref, s_wo_ref, s_bo_ref,
    # norm2 + src-attn params
    n2g_ref, n2b_ref, c_wq_ref, c_bq_ref, c_wo_ref, c_bo_ref,
    # norm3 + ffn params
    n3g_ref, n3b_ref, f_w1_ref, f_b1_ref, f_w2_ref, f_b2_ref,
    # output
    out_ref,
    *, n_head, tq,
):
    b = pl.program_id(0)
    qi = pl.program_id(1)

    residual = tgt_ref[...]                 # (tq, D) f32
    t_kv = self_kv_ref.shape[0]
    t_in = cross_kv_ref.shape[0]

    tgt_len = tgt_lens_ref[b]
    mem_len = mem_lens_ref[b]
    q_start = qi * tq

    # ---- masks generated in-kernel (no O(T^2) HBM mask traffic) ----
    # Assumes tgt_len/mem_len >= 1 (no fully-masked rows).
    row = jax.lax.broadcasted_iota(jnp.int32, (tq, t_kv), 0) + q_start
    col = jax.lax.broadcasted_iota(jnp.int32, (tq, t_kv), 1)
    self_valid = (col <= row) & (col < tgt_len)              # causal & padding
    mcol = jax.lax.broadcasted_iota(jnp.int32, (tq, t_in), 1)
    mem_valid = mcol < mem_len                               # padding only

    # ---- block 1: self attention (pre-LN); K/V already hoisted ----
    ln1_q = _layernorm(residual, n1g_ref[...], n1b_ref[...])
    sa = _mha(ln1_q, self_kv_ref[...], self_valid,
              s_wq_ref[...], s_bq_ref[...], s_wo_ref[...], s_bo_ref[...], n_head)
    x = residual + sa                        # dropout is identity in eval

    # ---- block 2: source attention; K/V already hoisted ----
    ln2 = _layernorm(x, n2g_ref[...], n2b_ref[...])
    ca = _mha(ln2, cross_kv_ref[...], mem_valid,
              c_wq_ref[...], c_bq_ref[...], c_wo_ref[...], c_bo_ref[...], n_head)
    x = x + ca

    # ---- block 3: feed forward (adapter is None -> adapt_x == 0) ----
    ln3 = _layernorm(x, n3g_ref[...], n3b_ref[...])
    out_ref[...] = x + _ffn(ln3, f_w1_ref, f_b1_ref, f_w2_ref, f_b2_ref)


def decoder_layer(tgt, tgt_lens, memory, mem_lens, params, *, n_head, tq=None):
    """tgt: (B, T_out, D) f32; memory: (B, T_in, D) f32.
    tgt_lens/mem_lens: (B,) int32 valid lengths (>= 1); the standard wenet
    causal+padding masks are generated in-kernel from these lengths."""
    (n1g, n1b, s_wq, s_bq, s_wkv, s_bkv, s_wo, s_bo,
     n2g, n2b, c_wq, c_bq, c_wkv, c_bkv, c_wo, c_bo,
     n3g, n3b, f_w1, f_b1, f_w2, f_b2) = params
    B, T_out, D = tgt.shape
    T_in = memory.shape[1]
    hidden = f_w1.shape[1]
    bf16 = jnp.bfloat16

    # ---- query tile: always tile long sequences; >=2 grid steps at B==1 ----
    if tq is None:
        if T_out > 256:
            tq = 128
        elif B == 1 and T_out % 16 == 0:
            tq = T_out // 2                  # feed both v7x TensorCores at B=1
        else:
            tq = T_out
    T_out_p = -(-T_out // tq) * tq           # pad T_out up to a tile multiple
    if T_out_p != T_out:
        tgt = jnp.pad(tgt, ((0, 0), (0, T_out_p - T_out), (0, 0)))
    n_q = T_out_p // tq

    # ---- hoisted once-per-sequence work: LN1 + both K|V projections (XLA) ----
    ln1_full = _layernorm(tgt, n1g, n1b)
    self_kv = (jnp.einsum('btd,de->bte', ln1_full.astype(bf16), s_wkv,
                          preferred_element_type=jnp.float32) + s_bkv).astype(bf16)
    cross_kv = (jnp.einsum('btd,de->bte', memory.astype(bf16), c_wkv,
                           preferred_element_type=jnp.float32) + c_bkv).astype(bf16)

    kernel_params = [n1g, n1b, s_wq, s_bq, s_wo, s_bo,
                     n2g, n2b, c_wq, c_bq, c_wo, c_bo,
                     n3g, n3b, f_w1, f_b1, f_w2, f_b2]

    data_specs = [
        pl.BlockSpec((None, tq, D), lambda b, qi, *_: (b, qi, 0)),          # tgt slice
        pl.BlockSpec((None, T_out_p, 2 * D), lambda b, qi, *_: (b, 0, 0)),  # self K|V
        pl.BlockSpec((None, T_in, 2 * D), lambda b, qi, *_: (b, 0, 0)),     # cross K|V
    ]
    # Parameters: full blocks, constant index -> single-buffer (halves VMEM).
    param_specs = [
        pl.BlockSpec(p.shape, lambda b, qi, *_, nd=p.ndim: (0,) * nd,
                     pipeline_mode=pl.Buffered(1))
        for p in kernel_params
    ]

    # ---- VMEM budget & cost estimate ----
    bytes_w = sum(int(p.size) * p.dtype.itemsize for p in kernel_params)   # 1-buffered
    bytes_data = 2 * (tq * D * 4                     # tgt block (double-buffered)
                      + T_out_p * 2 * D * 2          # self kv bf16
                      + T_in * 2 * D * 2             # cross kv bf16
                      + tq * D * 4)                  # output block
    ffn_chunk = 1024 if (hidden > 1024 and hidden % 1024 == 0) else hidden
    bytes_tmp = (3 * tq * max(T_out_p, T_in) * 4     # scores/probs live set
                 + tq * ffn_chunk * 4                # FFN intermediate
                 + 8 * tq * D * 4)                   # LN/residual/ctx temporaries
    vmem_limit = int(1.5 * (bytes_w + bytes_data + bytes_tmp)) + (4 << 20)
    vmem_limit = min(max(vmem_limit, 32 << 20), 100 << 20)

    flops = B * (8 * T_out_p * D * D
                 + 4 * T_out_p * D * (T_out_p + T_in)
                 + 4 * T_out_p * D * hidden)
    cost = pl.CostEstimate(
        flops=int(flops),
        transcendentals=int(B * T_out_p * (T_out_p + T_in)),
        bytes_accessed=int(bytes_w
                           + B * T_out_p * D * 4 * 2          # tgt in + out
                           + B * T_out_p * 2 * D * 2          # self kv
                           + B * T_in * 2 * D * 2))           # cross kv

    out = pl.pallas_call(
        functools.partial(_decoder_layer_kernel, n_head=n_head, tq=tq),
        out_shape=jax.ShapeDtypeStruct((B, T_out_p, D), jnp.float32),
        grid_spec=pltpu.PrefetchScalarGridSpec(
            num_scalar_prefetch=2,            # tgt_lens, mem_lens -> SMEM
            grid=(B, n_q),
            in_specs=data_specs + param_specs,
            out_specs=pl.BlockSpec((None, tq, D), lambda b, qi, *_: (b, qi, 0)),
        ),
        compiler_params=pltpu.CompilerParams(
            # Both axes independent (K/V hoisted) -> both TCs get work on v7x.
            dimension_semantics=("parallel", "parallel"),
            vmem_limit_bytes=vmem_limit),
        cost_estimate=cost,
    )(tgt_lens, mem_lens, tgt, self_kv, cross_kv, *kernel_params)
    return out[:, :T_out]


def _init_params(key, size, hidden):
    """Deterministic synthetic parameters.
    Linear weights stored (in, out) in bf16, K|V fused; biases/LN params f32."""
    keys = jax.random.split(key, 10)

    def w(k, fan_in, fan_out):
        return (jax.random.normal(k, (fan_in, fan_out), jnp.float32)
                / math.sqrt(fan_in)).astype(jnp.bfloat16)

    def b(n):
        return jnp.zeros((1, n), jnp.float32)

    ones = jnp.ones((1, size), jnp.float32)
    zeros = jnp.zeros((1, size), jnp.float32)
    return [
        # norm1
        ones, zeros,
        # self-attn: q, fused k|v, out
        w(keys[0], size, size), b(size),
        w(keys[1], size, 2 * size), b(2 * size),
        w(keys[2], size, size), b(size),
        # norm2
        ones, zeros,
        # src-attn: q, fused k|v, out
        w(keys[3], size, size), b(size),
        w(keys[4], size, 2 * size), b(2 * size),
        w(keys[5], size, size), b(size),
        # norm3
        ones, zeros,
        # ffn w_1 / w_2
        w(keys[6], size, hidden), b(hidden),
        w(keys[7], hidden, size), b(size),
    ]


def _reference(tgt, tgt_lens, memory, mem_lens, params, n_head):
    """Pure-JAX f32 reference with the same (bf16-stored) weights."""
    (n1g, n1b, swq, sbq, swkv, sbkv, swo, sbo,
     n2g, n2b, cwq, cbq, cwkv, cbkv, cwo, cbo,
     n3g, n3b, fw1, fb1, fw2, fb2) = params
    f32 = lambda a: a.astype(jnp.float32)
    B, T_out, D = tgt.shape
    T_in = memory.shape[1]
    dk = D // n_head

    def ln(x, g, b_):
        m = jnp.mean(x, -1, keepdims=True)
        xc = x - m
        v = jnp.mean(xc * xc, -1, keepdims=True)
        return xc * jax.lax.rsqrt(v + EPS) * g + b_

    def split_heads(x):
        return x.reshape(x.shape[0], x.shape[1], n_head, dk).transpose(0, 2, 1, 3)

    def mha(q_in, kv_in, valid, wq, bq, wkv, bkv, wo, bo):
        q = q_in @ f32(wq) + bq
        kv = kv_in @ f32(wkv) + bkv
        k, v = kv[..., :D], kv[..., D:]
        qh, kh, vh = split_heads(q), split_heads(k), split_heads(v)
        s = jnp.einsum('bhqd,bhkd->bhqk', qh, kh) / math.sqrt(dk)
        s = jnp.where(valid[:, None], s, NEG_INF)
        p = jax.nn.softmax(s, axis=-1)
        o = jnp.einsum('bhqk,bhkd->bhqd', p, vh)
        o = o.transpose(0, 2, 1, 3).reshape(q.shape[0], q.shape[1], D)
        return o @ f32(wo) + bo

    row = jnp.arange(T_out)[:, None]
    col = jnp.arange(T_out)[None, :]
    self_valid = (col <= row)[None] & (col[None] < tgt_lens[:, None, None])
    mem_valid = jnp.arange(T_in)[None, None, :] < mem_lens[:, None, None]

    x = tgt
    t1 = ln(x, n1g, n1b)
    x = x + mha(t1, t1, self_valid, swq, sbq, swkv, sbkv, swo, sbo)
    x = x + mha(ln(x, n2g, n2b), memory, mem_valid, cwq, cbq, cwkv, cbkv, cwo, cbo)
    t = ln(x, n3g, n3b)
    h = jnp.maximum(t @ f32(fw1) + fb1, 0.0)
    return x + h @ f32(fw2) + fb2


if __name__ == "__main__":
    # NOTE: D=32 / T=8,16 is far below one MXU tile — this config only checks
    # correctness; do not tune performance on it.
    B, T_OUT, T_IN, D, H, HIDDEN = 2, 8, 16, 32, 4, 64

    key = jax.random.PRNGKey(0)
    k_tgt, k_mem, k_par = jax.random.split(key, 3)

    tgt = jax.random.normal(k_tgt, (B, T_OUT, D), jnp.float32)
    memory = jax.random.normal(k_mem, (B, T_IN, D), jnp.float32)
    # per-batch valid lengths (second element padded) -> causal+padding masks
    tgt_lens = jnp.array([T_OUT, 6], jnp.int32)
    mem_lens = jnp.array([T_IN, 11], jnp.int32)

    params = _init_params(k_par, D, HIDDEN)

    out = decoder_layer(tgt, tgt_lens, memory, mem_lens, params, n_head=H)
    jax.block_until_ready(out)
    assert out.shape == (B, T_OUT, D)

    # Loose tolerance: kernel uses bf16 matmul operands with f32 accumulation.
    ref = _reference(tgt, tgt_lens, memory, mem_lens, params, H)
    err = float(jnp.max(jnp.abs(out - ref)))
    assert err < 0.2, f"max abs error vs reference too large: {err}"
    print("KERNEL_OK")
</pallas_src>

<mosaic_0001>
module attributes {stable_mosaic.version = 11 : i64} {
  func.func @_decoder_layer_kernel(%arg0: i32, %arg1: i32, %arg2: memref<2xi32, #tpu.memory_space<smem>>, %arg3: memref<2xi32, #tpu.memory_space<smem>>, %arg4: memref<1x8x32xf32, #tpu.memory_space<vmem>>, %arg5: memref<1x8x64xbf16, #tpu.memory_space<vmem>>, %arg6: memref<1x16x64xbf16, #tpu.memory_space<vmem>>, %arg7: memref<1x32xf32, #tpu.memory_space<vmem>>, %arg8: memref<1x32xf32, #tpu.memory_space<vmem>>, %arg9: memref<32x32xbf16, #tpu.memory_space<vmem>>, %arg10: memref<1x32xf32, #tpu.memory_space<vmem>>, %arg11: memref<32x32xbf16, #tpu.memory_space<vmem>>, %arg12: memref<1x32xf32, #tpu.memory_space<vmem>>, %arg13: memref<1x32xf32, #tpu.memory_space<vmem>>, %arg14: memref<1x32xf32, #tpu.memory_space<vmem>>, %arg15: memref<32x32xbf16, #tpu.memory_space<vmem>>, %arg16: memref<1x32xf32, #tpu.memory_space<vmem>>, %arg17: memref<32x32xbf16, #tpu.memory_space<vmem>>, %arg18: memref<1x32xf32, #tpu.memory_space<vmem>>, %arg19: memref<1x32xf32, #tpu.memory_space<vmem>>, %arg20: memref<1x32xf32, #tpu.memory_space<vmem>>, %arg21: memref<32x64xbf16, #tpu.memory_space<vmem>>, %arg22: memref<1x64xf32, #tpu.memory_space<vmem>>, %arg23: memref<64x32xbf16, #tpu.memory_space<vmem>>, %arg24: memref<1x32xf32, #tpu.memory_space<vmem>>, %arg25: memref<1x8x32xf32, #tpu.memory_space<vmem>>) attributes {dimension_semantics = [#tpu.dimension_semantics<parallel>, #tpu.dimension_semantics<parallel>], iteration_bounds = array<i64: 2, 1>, scalar_prefetch = 2 : i64, scratch_operands = 0 : i64, tpu.core_type = #tpu.core_type<tc>, window_params = [{transform_indices = @transform_0, window_bounds = array<i64: 1, 8, 32>}, {transform_indices = @transform_1, window_bounds = array<i64: 1, 8, 64>}, {transform_indices = @transform_2, window_bounds = array<i64: 1, 16, 64>}, {pipeline_mode = #tpu.pipeline_mode<synchronous>, transform_indices = @transform_3, window_bounds = array<i64: 1, 32>}, {pipeline_mode = #tpu.pipeline_mode<synchronous>, transform_indices = @transform_4, window_bounds = array<i64: 1, 32>}, {pipeline_mode = #tpu.pipeline_mode<synchronous>, transform_indices = @transform_5, window_bounds = array<i64: 32, 32>}, {pipeline_mode = #tpu.pipeline_mode<synchronous>, transform_indices = @transform_6, window_bounds = array<i64: 1, 32>}, {pipeline_mode = #tpu.pipeline_mode<synchronous>, transform_indices = @transform_7, window_bounds = array<i64: 32, 32>}, {pipeline_mode = #tpu.pipeline_mode<synchronous>, transform_indices = @transform_8, window_bounds = array<i64: 1, 32>}, {pipeline_mode = #tpu.pipeline_mode<synchronous>, transform_indices = @transform_9, window_bounds = array<i64: 1, 32>}, {pipeline_mode = #tpu.pipeline_mode<synchronous>, transform_indices = @transform_10, window_bounds = array<i64: 1, 32>}, {pipeline_mode = #tpu.pipeline_mode<synchronous>, transform_indices = @transform_11, window_bounds = array<i64: 32, 32>}, {pipeline_mode = #tpu.pipeline_mode<synchronous>, transform_indices = @transform_12, window_bounds = array<i64: 1, 32>}, {pipeline_mode = #tpu.pipeline_mode<synchronous>, transform_indices = @transform_13, window_bounds = array<i64: 32, 32>}, {pipeline_mode = #tpu.pipeline_mode<synchronous>, transform_indices = @transform_14, window_bounds = array<i64: 1, 32>}, {pipeline_mode = #tpu.pipeline_mode<synchronous>, transform_indices = @transform_15, window_bounds = array<i64: 1, 32>}, {pipeline_mode = #tpu.pipeline_mode<synchronous>, transform_indices = @transform_16, window_bounds = array<i64: 1, 32>}, {pipeline_mode = #tpu.pipeline_mode<synchronous>, transform_indices = @transform_17, window_bounds = array<i64: 32, 64>}, {pipeline_mode = #tpu.pipeline_mode<synchronous>, transform_indices = @transform_18, window_bounds = array<i64: 1, 64>}, {pipeline_mode = #tpu.pipeline_mode<synchronous>, transform_indices = @transform_19, window_bounds = array<i64: 64, 32>}, {pipeline_mode = #tpu.pipeline_mode<synchronous>, transform_indices = @transform_20, window_bounds = array<i64: 1, 32>}, {transform_indices = @transform_21, window_bounds = array<i64: 1, 8, 32>}]} {
    %c0 = arith.constant 0 : index
    %c0_0 = arith.constant 0 : index
    %c0_1 = arith.constant 0 : index
    %0 = vector.load %arg4[%c0, %c0_0, %c0_1] : memref<1x8x32xf32, #tpu.memory_space<vmem>>, vector<1x8x32xf32>
    %1 = vector.shape_cast %0 : vector<1x8x32xf32> to vector<8x32xf32>
    %2 = arith.index_cast %arg0 : i32 to index
    %3 = memref.load %arg2[%2] : memref<2xi32, #tpu.memory_space<smem>>
    %4 = arith.index_cast %arg0 : i32 to index
    %5 = memref.load %arg3[%4] : memref<2xi32, #tpu.memory_space<smem>>
    %c8_i32 = arith.constant 8 : i32
    %6 = arith.muli %arg1, %c8_i32 : i32
    %7 = tpu.iota {dimensions = array<i32: 0>} : vector<8x8xi32>
    %8 = vector.broadcast %6 : i32 to vector<8x8xi32>
    %9 = arith.addi %7, %8 : vector<8x8xi32>
    %10 = tpu.iota {dimensions = array<i32: 1>} : vector<8x8xi32>
    %11 = arith.cmpi sle, %10, %9 : vector<8x8xi32>
    %12 = vector.broadcast %3 : i32 to vector<8x8xi32>
    %13 = arith.cmpi slt, %10, %12 : vector<8x8xi32>
    %14 = arith.andi %11, %13 : vector<8x8xi1>
    %15 = tpu.iota {dimensions = array<i32: 1>} : vector<8x16xi32>
    %16 = vector.broadcast %5 : i32 to vector<8x16xi32>
    %17 = arith.cmpi slt, %15, %16 : vector<8x16xi32>
    %c0_2 = arith.constant 0 : index
    %c0_3 = arith.constant 0 : index
    %18 = vector.load %arg7[%c0_2, %c0_3] : memref<1x32xf32, #tpu.memory_space<vmem>>, vector<1x32xf32>
    %c0_4 = arith.constant 0 : index
    %c0_5 = arith.constant 0 : index
    %19 = vector.load %arg8[%c0_4, %c0_5] : memref<1x32xf32, #tpu.memory_space<vmem>>, vector<1x32xf32>
    %cst = arith.constant dense<0.000000e+00> : vector<8xf32>
    %20 = vector.multi_reduction <add>, %1, %cst [1] : vector<8x32xf32> to vector<8xf32>
    %21 = vector.shape_cast %20 : vector<8xf32> to vector<8x1xf32>
    %cst_6 = arith.constant 3.200000e+01 : f32
    %22 = vector.broadcast %cst_6 : f32 to vector<8x1xf32>
    %23 = arith.divf %21, %22 : vector<8x1xf32>
    %24 = vector.broadcast %23 : vector<8x1xf32> to vector<8x32xf32>
    %25 = arith.subf %1, %24 : vector<8x32xf32>
    %26 = arith.mulf %25, %25 : vector<8x32xf32>
    %cst_7 = arith.constant dense<0.000000e+00> : vector<8xf32>
    %27 = vector.multi_reduction <add>, %26, %cst_7 [1] : vector<8x32xf32> to vector<8xf32>
    %28 = vector.shape_cast %27 : vector<8xf32> to vector<8x1xf32>
    %cst_8 = arith.constant 3.200000e+01 : f32
    %29 = vector.broadcast %cst_8 : f32 to vector<8x1xf32>
    %30 = arith.divf %28, %29 : vector<8x1xf32>
    %cst_9 = arith.constant 9.99999996E-13 : f32
    %31 = vector.broadcast %cst_9 : f32 to vector<8x1xf32>
    %32 = arith.addf %30, %31 : vector<8x1xf32>
    %33 = math.rsqrt %32 : vector<8x1xf32>
    %34 = vector.broadcast %33 : vector<8x1xf32> to vector<8x32xf32>
    %35 = arith.mulf %25, %34 : vector<8x32xf32>
    %36 = vector.broadcast %18 : vector<1x32xf32> to vector<8x32xf32>
    %37 = arith.mulf %35, %36 : vector<8x32xf32>
    %38 = vector.broadcast %19 : vector<1x32xf32> to vector<8x32xf32>
    %39 = arith.addf %37, %38 : vector<8x32xf32>
    %c0_10 = arith.constant 0 : index
    %c0_11 = arith.constant 0 : index
    %c0_12 = arith.constant 0 : index
    %40 = vector.load %arg5[%c0_10, %c0_11, %c0_12] : memref<1x8x64xbf16, #tpu.memory_space<vmem>>, vector<1x8x64xbf16>
    %41 = vector.shape_cast %40 : vector<1x8x64xbf16> to vector<8x64xbf16>
    %c0_13 = arith.constant 0 : index
    %c0_14 = arith.constant 0 : index
    %42 = vector.load %arg9[%c0_13, %c0_14] : memref<32x32xbf16, #tpu.memory_space<vmem>>, vector<32x32xbf16>
    %c0_15 = arith.constant 0 : index
    %c0_16 = arith.constant 0 : index
    %43 = vector.load %arg10[%c0_15, %c0_16] : memref<1x32xf32, #tpu.memory_space<vmem>>, vector<1x32xf32>
    %c0_17 = arith.constant 0 : index
    %c0_18 = arith.constant 0 : index
    %44 = vector.load %arg11[%c0_17, %c0_18] : memref<32x32xbf16, #tpu.memory_space<vmem>>, vector<32x32xbf16>
    %c0_19 = arith.constant 0 : index
    %c0_20 = arith.constant 0 : index
    %45 = vector.load %arg12[%c0_19, %c0_20] : memref<1x32xf32, #tpu.memory_space<vmem>>, vector<1x32xf32>
    %46 = arith.truncf %39 : vector<8x32xf32> to vector<8x32xbf16>
    %cst_21 = arith.constant dense<0.000000e+00> : vector<8x32xf32>
    %47 = tpu.matmul %46, %42, %cst_21 {dimension_numbers = #tpu.dot_dimension_numbers<[1], [0], [0], [1], [0, 0, 1, 1], [], []>} : vector<8x32xbf16>, vector<32x32xbf16>, vector<8x32xf32> -> vector<8x32xf32>
    %48 = vector.broadcast %43 : vector<1x32xf32> to vector<8x32xf32>
    %49 = arith.addf %47, %48 : vector<8x32xf32>
    %cst_22 = arith.constant 0.353553385 : f32
    %50 = vector.broadcast %cst_22 : f32 to vector<8x32xf32>
    %51 = arith.mulf %49, %50 : vector<8x32xf32>
    %52 = vector.extract_strided_slice %41 {offsets = [0, 0], sizes = [8, 32], strides = [1, 1]} : vector<8x64xbf16> to vector<8x32xbf16>
    %53 = vector.extract_strided_slice %41 {offsets = [0, 32], sizes = [8, 32], strides = [1, 1]} : vector<8x64xbf16> to vector<8x32xbf16>
    %54 = vector.extract_strided_slice %51 {offsets = [0, 0], sizes = [8, 8], strides = [1, 1]} : vector<8x32xf32> to vector<8x8xf32>
    %55 = arith.truncf %54 : vector<8x8xf32> to vector<8x8xbf16>
    %56 = vector.extract_strided_slice %52 {offsets = [0, 0], sizes = [8, 8], strides = [1, 1]} : vector<8x32xbf16> to vector<8x8xbf16>
    %cst_23 = arith.constant dense<0.000000e+00> : vector<8x8xf32>
    %57 = tpu.matmul %55, %56, %cst_23 {dimension_numbers = #tpu.dot_dimension_numbers<[1], [1], [0], [0], [0, 0, 1, 0], [], []>} : vector<8x8xbf16>, vector<8x8xbf16>, vector<8x8xf32> -> vector<8x8xf32>
    %cst_24 = arith.constant -1.000000e+30 : f32
    %58 = vector.broadcast %cst_24 : f32 to vector<8x8xf32>
    %59 = arith.select %14, %57, %58 : vector<8x8xi1>, vector<8x8xf32>
    %cst_25 = arith.constant dense<0xFF800000> : vector<8xf32>
    %60 = vector.multi_reduction <maximumf>, %59, %cst_25 [1] : vector<8x8xf32> to vector<8xf32>
    %61 = vector.shape_cast %60 : vector<8xf32> to vector<8x1xf32>
    %62 = vector.broadcast %61 : vector<8x1xf32> to vector<8x8xf32>
    %63 = arith.subf %59, %62 : vector<8x8xf32>
    %64 = math.exp %63 : vector<8x8xf32>
    %cst_26 = arith.constant dense<0.000000e+00> : vector<8xf32>
    %65 = vector.multi_reduction <add>, %64, %cst_26 [1] : vector<8x8xf32> to vector<8xf32>
    %66 = vector.shape_cast %65 : vector<8xf32> to vector<8x1xf32>
    %67 = vector.broadcast %66 : vector<8x1xf32> to vector<8x8xf32>
    %68 = arith.divf %64, %67 : vector<8x8xf32>
    %69 = arith.truncf %68 : vector<8x8xf32> to vector<8x8xbf16>
    %70 = vector.extract_strided_slice %53 {offsets = [0, 0], sizes = [8, 8], strides = [1, 1]} : vector<8x32xbf16> to vector<8x8xbf16>
    %cst_27 = arith.constant dense<0.000000e+00> : vector<8x8xf32>
    %71 = tpu.matmul %69, %70, %cst_27 {dimension_numbers = #tpu.dot_dimension_numbers<[1], [0], [0], [1], [0, 0, 1, 1], [], []>} : vector<8x8xbf16>, vector<8x8xbf16>, vector<8x8xf32> -> vector<8x8xf32>
    %72 = vector.extract_strided_slice %51 {offsets = [0, 8], sizes = [8, 8], strides = [1, 1]} : vector<8x32xf32> to vector<8x8xf32>
    %73 = arith.truncf %72 : vector<8x8xf32> to vector<8x8xbf16>
    %74 = vector.extract_strided_slice %52 {offsets = [0, 8], sizes = [8, 8], strides = [1, 1]} : vector<8x32xbf16> to vector<8x8xbf16>
    %cst_28 = arith.constant dense<0.000000e+00> : vector<8x8xf32>
    %75 = tpu.matmul %73, %74, %cst_28 {dimension_numbers = #tpu.dot_dimension_numbers<[1], [1], [0], [0], [0, 0, 1, 0], [], []>} : vector<8x8xbf16>, vector<8x8xbf16>, vector<8x8xf32> -> vector<8x8xf32>
    %cst_29 = arith.constant -1.000000e+30 : f32
    %76 = vector.broadcast %cst_29 : f32 to vector<8x8xf32>
    %77 = arith.select %14, %75, %76 : vector<8x8xi1>, vector<8x8xf32>
    %cst_30 = arith.constant dense<0xFF800000> : vector<8xf32>
    %78 = vector.multi_reduction <maximumf>, %77, %cst_30 [1] : vector<8x8xf32> to vector<8xf32>
    %79 = vector.shape_cast %78 : vector<8xf32> to vector<8x1xf32>
    %80 = vector.broadcast %79 : vector<8x1xf32> to vector<8x8xf32>
    %81 = arith.subf %77, %80 : vector<8x8xf32>
    %82 = math.exp %81 : vector<8x8xf32>
    %cst_31 = arith.constant dense<0.000000e+00> : vector<8xf32>
    %83 = vector.multi_reduction <add>, %82, %cst_31 [1] : vector<8x8xf32> to vector<8xf32>
    %84 = vector.shape_cast %83 : vector<8xf32> to vector<8x1xf32>
    %85 = vector.broadcast %84 : vector<8x1xf32> to vector<8x8xf32>
    %86 = arith.divf %82, %85 : vector<8x8xf32>
    %87 = arith.truncf %86 : vector<8x8xf32> to vector<8x8xbf16>
    %88 = vector.extract_strided_slice %53 {offsets = [0, 8], sizes = [8, 8], strides = [1, 1]} : vector<8x32xbf16> to vector<8x8xbf16>
    %cst_32 = arith.constant dense<0.000000e+00> : vector<8x8xf32>
    %89 = tpu.matmul %87, %88, %cst_32 {dimension_numbers = #tpu.dot_dimension_numbers<[1], [0], [0], [1], [0, 0, 1, 1], [], []>} : vector<8x8xbf16>, vector<8x8xbf16>, vector<8x8xf32> -> vector<8x8xf32>
    %90 = vector.extract_strided_slice %51 {offsets = [0, 16], sizes = [8, 8], strides = [1, 1]} : vector<8x32xf32> to vector<8x8xf32>
    %91 = arith.truncf %90 : vector<8x8xf32> to vector<8x8xbf16>
    %92 = vector.extract_strided_slice %52 {offsets = [0, 16], sizes = [8, 8], strides = [1, 1]} : vector<8x32xbf16> to vector<8x8xbf16>
    %cst_33 = arith.constant dense<0.000000e+00> : vector<8x8xf32>
    %93 = tpu.matmul %91, %92, %cst_33 {dimension_numbers = #tpu.dot_dimension_numbers<[1], [1], [0], [0], [0, 0, 1, 0], [], []>} : vector<8x8xbf16>, vector<8x8xbf16>, vector<8x8xf32> -> vector<8x8xf32>
    %cst_34 = arith.constant -1.000000e+30 : f32
    %94 = vector.broadcast %cst_34 : f32 to vector<8x8xf32>
    %95 = arith.select %14, %93, %94 : vector<8x8xi1>, vector<8x8xf32>
    %cst_35 = arith.constant dense<0xFF800000> : vector<8xf32>
    %96 = vector.multi_reduction <maximumf>, %95, %cst_35 [1] : vector<8x8xf32> to vector<8xf32>
    %97 = vector.shape_cast %96 : vector<8xf32> to vector<8x1xf32>
    %98 = vector.broadcast %97 : vector<8x1xf32> to vector<8x8xf32>
    %99 = arith.subf %95, %98 : vector<8x8xf32>
    %100 = math.exp %99 : vector<8x8xf32>
    %cst_36 = arith.constant dense<0.000000e+00> : vector<8xf32>
    %101 = vector.multi_reduction <add>, %100, %cst_36 [1] : vector<8x8xf32> to vector<8xf32>
    %102 = vector.shape_cast %101 : vector<8xf32> to vector<8x1xf32>
    %103 = vector.broadcast %102 : vector<8x1xf32> to vector<8x8xf32>
    %104 = arith.divf %100, %103 : vector<8x8xf32>
    %105 = arith.truncf %104 : vector<8x8xf32> to vector<8x8xbf16>
    %106 = vector.extract_strided_slice %53 {offsets = [0, 16], sizes = [8, 8], strides = [1, 1]} : vector<8x32xbf16> to vector<8x8xbf16>
    %cst_37 = arith.constant dense<0.000000e+00> : vector<8x8xf32>
    %107 = tpu.matmul %105, %106, %cst_37 {dimension_numbers = #tpu.dot_dimension_numbers<[1], [0], [0], [1], [0, 0, 1, 1], [], []>} : vector<8x8xbf16>, vector<8x8xbf16>, vector<8x8xf32> -> vector<8x8xf32>
    %108 = vector.extract_strided_slice %51 {offsets = [0, 24], sizes = [8, 8], strides = [1, 1]} : vector<8x32xf32> to vector<8x8xf32>
    %109 = arith.truncf %108 : vector<8x8xf32> to vector<8x8xbf16>
    %110 = vector.extract_strided_slice %52 {offsets = [0, 24], sizes = [8, 8], strides = [1, 1]} : vector<8x32xbf16> to vector<8x8xbf16>
    %cst_38 = arith.constant dense<0.000000e+00> : vector<8x8xf32>
    %111 = tpu.matmul %109, %110, %cst_38 {dimension_numbers = #tpu.dot_dimension_numbers<[1], [1], [0], [0], [0, 0, 1, 0], [], []>} : vector<8x8xbf16>, vector<8x8xbf16>, vector<8x8xf32> -> vector<8x8xf32>
    %cst_39 = arith.constant -1.000000e+30 : f32
    %112 = vector.broadcast %cst_39 : f32 to vector<8x8xf32>
    %113 = arith.select %14, %111, %112 : vector<8x8xi1>, vector<8x8xf32>
    %cst_40 = arith.constant dense<0xFF800000> : vector<8xf32>
    %114 = vector.multi_reduction <maximumf>, %113, %cst_40 [1] : vector<8x8xf32> to vector<8xf32>
    %115 = vector.shape_cast %114 : vector<8xf32> to vector<8x1xf32>
    %116 = vector.broadcast %115 : vector<8x1xf32> to vector<8x8xf32>
    %117 = arith.subf %113, %116 : vector<8x8xf32>
    %118 = math.exp %117 : vector<8x8xf32>
    %cst_41 = arith.constant dense<0.000000e+00> : vector<8xf32>
    %119 = vector.multi_reduction <add>, %118, %cst_41 [1] : vector<8x8xf32> to vector<8xf32>
    %120 = vector.shape_cast %119 : vector<8xf32> to vector<8x1xf32>
    %121 = vector.broadcast %120 : vector<8x1xf32> to vector<8x8xf32>
    %122 = arith.divf %118, %121 : vector<8x8xf32>
    %123 = arith.truncf %122 : vector<8x8xf32> to vector<8x8xbf16>
    %124 = vector.extract_strided_slice %53 {offsets = [0, 24], sizes = [8, 8], strides = [1, 1]} : vector<8x32xbf16> to vector<8x8xbf16>
    %cst_42 = arith.constant dense<0.000000e+00> : vector<8x8xf32>
    %125 = tpu.matmul %123, %124, %cst_42 {dimension_numbers = #tpu.dot_dimension_numbers<[1], [0], [0], [1], [0, 0, 1, 1], [], []>} : vector<8x8xbf16>, vector<8x8xbf16>, vector<8x8xf32> -> vector<8x8xf32>
    %126 = tpu.concatenate %71, %89, %107, %125 in 1 : vector<8x8xf32>, vector<8x8xf32>, vector<8x8xf32>, vector<8x8xf32> -> vector<8x32xf32>
    %127 = arith.truncf %126 : vector<8x32xf32> to vector<8x32xbf16>
    %cst_43 = arith.constant dense<0.000000e+00> : vector<8x32xf32>
    %128 = tpu.matmul %127, %44, %cst_43 {dimension_numbers = #tpu.dot_dimension_numbers<[1], [0], [0], [1], [0, 0, 1, 1], [], []>} : vector<8x32xbf16>, vector<32x32xbf16>, vector<8x32xf32> -> vector<8x32xf32>
    %129 = vector.broadcast %45 : vector<1x32xf32> to vector<8x32xf32>
    %130 = arith.addf %128, %129 : vector<8x32xf32>
    %131 = arith.addf %1, %130 : vector<8x32xf32>
    %c0_44 = arith.constant 0 : index
    %c0_45 = arith.constant 0 : index
    %132 = vector.load %arg13[%c0_44, %c0_45] : memref<1x32xf32, #tpu.memory_space<vmem>>, vector<1x32xf32>
    %c0_46 = arith.constant 0 : index
    %c0_47 = arith.constant 0 : index
    %133 = vector.load %arg14[%c0_46, %c0_47] : memref<1x32xf32, #tpu.memory_space<vmem>>, vector<1x32xf32>
    %cst_48 = arith.constant dense<0.000000e+00> : vector<8xf32>
    %134 = vector.multi_reduction <add>, %131, %cst_48 [1] : vector<8x32xf32> to vector<8xf32>
    %135 = vector.shape_cast %134 : vector<8xf32> to vector<8x1xf32>
    %cst_49 = arith.constant 3.200000e+01 : f32
    %136 = vector.broadcast %cst_49 : f32 to vector<8x1xf32>
    %137 = arith.divf %135, %136 : vector<8x1xf32>
    %138 = vector.broadcast %137 : vector<8x1xf32> to vector<8x32xf32>
    %139 = arith.subf %131, %138 : vector<8x32xf32>
    %140 = arith.mulf %139, %139 : vector<8x32xf32>
    %cst_50 = arith.constant dense<0.000000e+00> : vector<8xf32>
    %141 = vector.multi_reduction <add>, %140, %cst_50 [1] : vector<8x32xf32> to vector<8xf32>
    %142 = vector.shape_cast %141 : vector<8xf32> to vector<8x1xf32>
    %cst_51 = arith.constant 3.200000e+01 : f32
    %143 = vector.broadcast %cst_51 : f32 to vector<8x1xf32>
    %144 = arith.divf %142, %143 : vector<8x1xf32>
    %cst_52 = arith.constant 9.99999996E-13 : f32
    %145 = vector.broadcast %cst_52 : f32 to vector<8x1xf32>
    %146 = arith.addf %144, %145 : vector<8x1xf32>
    %147 = math.rsqrt %146 : vector<8x1xf32>
    %148 = vector.broadcast %147 : vector<8x1xf32> to vector<8x32xf32>
    %149 = arith.mulf %139, %148 : vector<8x32xf32>
    %150 = vector.broadcast %132 : vector<1x32xf32> to vector<8x32xf32>
    %151 = arith.mulf %149, %150 : vector<8x32xf32>
    %152 = vector.broadcast %133 : vector<1x32xf32> to vector<8x32xf32>
    %153 = arith.addf %151, %152 : vector<8x32xf32>
    %c0_53 = arith.constant 0 : index
    %c0_54 = arith.constant 0 : index
    %c0_55 = arith.constant 0 : index
    %154 = vector.load %arg6[%c0_53, %c0_54, %c0_55] : memref<1x16x64xbf16, #tpu.memory_space<vmem>>, vector<1x16x64xbf16>
    %155 = vector.shape_cast %154 : vector<1x16x64xbf16> to vector<16x64xbf16>
    %c0_56 = arith.constant 0 : index
    %c0_57 = arith.constant 0 : index
    %156 = vector.load %arg15[%c0_56, %c0_57] : memref<32x32xbf16, #tpu.memory_space<vmem>>, vector<32x32xbf16>
    %c0_58 = arith.constant 0 : index
    %c0_59 = arith.constant 0 : index
    %157 = vector.load %arg16[%c0_58, %c0_59] : memref<1x32xf32, #tpu.memory_space<vmem>>, vector<1x32xf32>
    %c0_60 = arith.constant 0 : index
    %c0_61 = arith.constant 0 : index
    %158 = vector.load %arg17[%c0_60, %c0_61] : memref<32x32xbf16, #tpu.memory_space<vmem>>, vector<32x32xbf16>
    %c0_62 = arith.constant 0 : index
    %c0_63 = arith.constant 0 : index
    %159 = vector.load %arg18[%c0_62, %c0_63] : memref<1x32xf32, #tpu.memory_space<vmem>>, vector<1x32xf32>
    %160 = arith.truncf %153 : vector<8x32xf32> to vector<8x32xbf16>
    %cst_64 = arith.constant dense<0.000000e+00> : vector<8x32xf32>
    %161 = tpu.matmul %160, %156, %cst_64 {dimension_numbers = #tpu.dot_dimension_numbers<[1], [0], [0], [1], [0, 0, 1, 1], [], []>} : vector<8x32xbf16>, vector<32x32xbf16>, vector<8x32xf32> -> vector<8x32xf32>
    %162 = vector.broadcast %157 : vector<1x32xf32> to vector<8x32xf32>
    %163 = arith.addf %161, %162 : vector<8x32xf32>
    %cst_65 = arith.constant 0.353553385 : f32
    %164 = vector.broadcast %cst_65 : f32 to vector<8x32xf32>
    %165 = arith.mulf %163, %164 : vector<8x32xf32>
    %166 = vector.extract_strided_slice %155 {offsets = [0, 0], sizes = [16, 32], strides = [1, 1]} : vector<16x64xbf16> to vector<16x32xbf16>
    %167 = vector.extract_strided_slice %155 {offsets = [0, 32], sizes = [16, 32], strides = [1, 1]} : vector<16x64xbf16> to vector<16x32xbf16>
    %168 = vector.extract_strided_slice %165 {offsets = [0, 0], sizes = [8, 8], strides = [1, 1]} : vector<8x32xf32> to vector<8x8xf32>
    %169 = arith.truncf %168 : vector<8x8xf32> to vector<8x8xbf16>
    %170 = vector.extract_strided_slice %166 {offsets = [0, 0], sizes = [16, 8], strides = [1, 1]} : vector<16x32xbf16> to vector<16x8xbf16>
    %cst_66 = arith.constant dense<0.000000e+00> : vector<8x16xf32>
    %171 = tpu.matmul %169, %170, %cst_66 {dimension_numbers = #tpu.dot_dimension_numbers<[1], [1], [0], [0], [0, 0, 1, 0], [], []>} : vector<8x8xbf16>, vector<16x8xbf16>, vector<8x16xf32> -> vector<8x16xf32>
    %cst_67 = arith.constant -1.000000e+30 : f32
    %172 = vector.broadcast %cst_67 : f32 to vector<8x16xf32>
    %173 = arith.select %17, %171, %172 : vector<8x16xi1>, vector<8x16xf32>
    %cst_68 = arith.constant dense<0xFF800000> : vector<8xf32>
    %174 = vector.multi_reduction <maximumf>, %173, %cst_68 [1] : vector<8x16xf32> to vector<8xf32>
    %175 = vector.shape_cast %174 : vector<8xf32> to vector<8x1xf32>
    %176 = vector.broadcast %175 : vector<8x1xf32> to vector<8x16xf32>
    %177 = arith.subf %173, %176 : vector<8x16xf32>
    %178 = math.exp %177 : vector<8x16xf32>
    %cst_69 = arith.constant dense<0.000000e+00> : vector<8xf32>
    %179 = vector.multi_reduction <add>, %178, %cst_69 [1] : vector<8x16xf32> to vector<8xf32>
    %180 = vector.shape_cast %179 : vector<8xf32> to vector<8x1xf32>
    %181 = vector.broadcast %180 : vector<8x1xf32> to vector<8x16xf32>
    %182 = arith.divf %178, %181 : vector<8x16xf32>
    %183 = arith.truncf %182 : vector<8x16xf32> to vector<8x16xbf16>
    %184 = vector.extract_strided_slice %167 {offsets = [0, 0], sizes = [16, 8], strides = [1, 1]} : vector<16x32xbf16> to vector<16x8xbf16>
    %cst_70 = arith.constant dense<0.000000e+00> : vector<8x8xf32>
    %185 = tpu.matmul %183, %184, %cst_70 {dimension_numbers = #tpu.dot_dimension_numbers<[1], [0], [0], [1], [0, 0, 1, 1], [], []>} : vector<8x16xbf16>, vector<16x8xbf16>, vector<8x8xf32> -> vector<8x8xf32>
    %186 = vector.extract_strided_slice %165 {offsets = [0, 8], sizes = [8, 8], strides = [1, 1]} : vector<8x32xf32> to vector<8x8xf32>
    %187 = arith.truncf %186 : vector<8x8xf32> to vector<8x8xbf16>
    %188 = vector.extract_strided_slice %166 {offsets = [0, 8], sizes = [16, 8], strides = [1, 1]} : vector<16x32xbf16> to vector<16x8xbf16>
    %cst_71 = arith.constant dense<0.000000e+00> : vector<8x16xf32>
    %189 = tpu.matmul %187, %188, %cst_71 {dimension_numbers = #tpu.dot_dimension_numbers<[1], [1], [0], [0], [0, 0, 1, 0], [], []>} : vector<8x8xbf16>, vector<16x8xbf16>, vector<8x16xf32> -> vector<8x16xf32>
    %cst_72 = arith.constant -1.000000e+30 : f32
    %190 = vector.broadcast %cst_72 : f32 to vector<8x16xf32>
    %191 = arith.select %17, %189, %190 : vector<8x16xi1>, vector<8x16xf32>
    %cst_73 = arith.constant dense<0xFF800000> : vector<8xf32>
    %192 = vector.multi_reduction <maximumf>, %191, %cst_73 [1] : vector<8x16xf32> to vector<8xf32>
    %193 = vector.shape_cast %192 : vector<8xf32> to vector<8x1xf32>
    %194 = vector.broadcast %193 : vector<8x1xf32> to vector<8x16xf32>
    %195 = arith.subf %191, %194 : vector<8x16xf32>
    %196 = math.exp %195 : vector<8x16xf32>
    %cst_74 = arith.constant dense<0.000000e+00> : vector<8xf32>
    %197 = vector.multi_reduction <add>, %196, %cst_74 [1] : vector<8x16xf32> to vector<8xf32>
    %198 = vector.shape_cast %197 : vector<8xf32> to vector<8x1xf32>
    %199 = vector.broadcast %198 : vector<8x1xf32> to vector<8x16xf32>
    %200 = arith.divf %196, %199 : vector<8x16xf32>
    %201 = arith.truncf %200 : vector<8x16xf32> to vector<8x16xbf16>
    %202 = vector.extract_strided_slice %167 {offsets = [0, 8], sizes = [16, 8], strides = [1, 1]} : vector<16x32xbf16> to vector<16x8xbf16>
    %cst_75 = arith.constant dense<0.000000e+00> : vector<8x8xf32>
    %203 = tpu.matmul %201, %202, %cst_75 {dimension_numbers = #tpu.dot_dimension_numbers<[1], [0], [0], [1], [0, 0, 1, 1], [], []>} : vector<8x16xbf16>, vector<16x8xbf16>, vector<8x8xf32> -> vector<8x8xf32>
    %204 = vector.extract_strided_slice %165 {offsets = [0, 16], sizes = [8, 8], strides = [1, 1]} : vector<8x32xf32> to vector<8x8xf32>
    %205 = arith.truncf %204 : vector<8x8xf32> to vector<8x8xbf16>
    %206 = vector.extract_strided_slice %166 {offsets = [0, 16], sizes = [16, 8], strides = [1, 1]} : vector<16x32xbf16> to vector<16x8xbf16>
    %cst_76 = arith.constant dense<0.000000e+00> : vector<8x16xf32>
    %207 = tpu.matmul %205, %206, %cst_76 {dimension_numbers = #tpu.dot_dimension_numbers<[1], [1], [0], [0], [0, 0, 1, 0], [], []>} : vector<8x8xbf16>, vector<16x8xbf16>, vector<8x16xf32> -> vector<8x16xf32>
    %cst_77 = arith.constant -1.000000e+30 : f32
    %208 = vector.broadcast %cst_77 : f32 to vector<8x16xf32>
    %209 = arith.select %17, %207, %208 : vector<8x16xi1>, vector<8x16xf32>
    %cst_78 = arith.constant dense<0xFF800000> : vector<8xf32>
    %210 = vector.multi_reduction <maximumf>, %209, %cst_78 [1] : vector<8x16xf32> to vector<8xf32>
    %211 = vector.shape_cast %210 : vector<8xf32> to vector<8x1xf32>
    %212 = vector.broadcast %211 : vector<8x1xf32> to vector<8x16xf32>
    %213 = arith.subf %209, %212 : vector<8x16xf32>
    %214 = math.exp %213 : vector<8x16xf32>
    %cst_79 = arith.constant dense<0.000000e+00> : vector<8xf32>
    %215 = vector.multi_reduction <add>, %214, %cst_79 [1] : vector<8x16xf32> to vector<8xf32>
    %216 = vector.shape_cast %215 : vector<8xf32> to vector<8x1xf32>
    %217 = vector.broadcast %216 : vector<8x1xf32> to vector<8x16xf32>
    %218 = arith.divf %214, %217 : vector<8x16xf32>
    %219 = arith.truncf %218 : vector<8x16xf32> to vector<8x16xbf16>
    %220 = vector.extract_strided_slice %167 {offsets = [0, 16], sizes = [16, 8], strides = [1, 1]} : vector<16x32xbf16> to vector<16x8xbf16>
    %cst_80 = arith.constant dense<0.000000e+00> : vector<8x8xf32>
    %221 = tpu.matmul %219, %220, %cst_80 {dimension_numbers = #tpu.dot_dimension_numbers<[1], [0], [0], [1], [0, 0, 1, 1], [], []>} : vector<8x16xbf16>, vector<16x8xbf16>, vector<8x8xf32> -> vector<8x8xf32>
    %222 = vector.extract_strided_slice %165 {offsets = [0, 24], sizes = [8, 8], strides = [1, 1]} : vector<8x32xf32> to vector<8x8xf32>
    %223 = arith.truncf %222 : vector<8x8xf32> to vector<8x8xbf16>
    %224 = vector.extract_strided_slice %166 {offsets = [0, 24], sizes = [16, 8], strides = [1, 1]} : vector<16x32xbf16> to vector<16x8xbf16>
    %cst_81 = arith.constant dense<0.000000e+00> : vector<8x16xf32>
    %225 = tpu.matmul %223, %224, %cst_81 {dimension_numbers = #tpu.dot_dimension_numbers<[1], [1], [0], [0], [0, 0, 1, 0], [], []>} : vector<8x8xbf16>, vector<16x8xbf16>, vector<8x16xf32> -> vector<8x16xf32>
    %cst_82 = arith.constant -1.000000e+30 : f32
    %226 = vector.broadcast %cst_82 : f32 to vector<8x16xf32>
    %227 = arith.select %17, %225, %226 : vector<8x16xi1>, vector<8x16xf32>
    %cst_83 = arith.constant dense<0xFF800000> : vector<8xf32>
    %228 = vector.multi_reduction <maximumf>, %227, %cst_83 [1] : vector<8x16xf32> to vector<8xf32>
    %229 = vector.shape_cast %228 : vector<8xf32> to vector<8x1xf32>
    %230 = vector.broadcast %229 : vector<8x1xf32> to vector<8x16xf32>
    %231 = arith.subf %227, %230 : vector<8x16xf32>
    %232 = math.exp %231 : vector<8x16xf32>
    %cst_84 = arith.constant dense<0.000000e+00> : vector<8xf32>
    %233 = vector.multi_reduction <add>, %232, %cst_84 [1] : vector<8x16xf32> to vector<8xf32>
    %234 = vector.shape_cast %233 : vector<8xf32> to vector<8x1xf32>
    %235 = vector.broadcast %234 : vector<8x1xf32> to vector<8x16xf32>
    %236 = arith.divf %232, %235 : vector<8x16xf32>
    %237 = arith.truncf %236 : vector<8x16xf32> to vector<8x16xbf16>
    %238 = vector.extract_strided_slice %167 {offsets = [0, 24], sizes = [16, 8], strides = [1, 1]} : vector<16x32xbf16> to vector<16x8xbf16>
    %cst_85 = arith.constant dense<0.000000e+00> : vector<8x8xf32>
    %239 = tpu.matmul %237, %238, %cst_85 {dimension_numbers = #tpu.dot_dimension_numbers<[1], [0], [0], [1], [0, 0, 1, 1], [], []>} : vector<8x16xbf16>, vector<16x8xbf16>, vector<8x8xf32> -> vector<8x8xf32>
    %240 = tpu.concatenate %185, %203, %221, %239 in 1 : vector<8x8xf32>, vector<8x8xf32>, vector<8x8xf32>, vector<8x8xf32> -> vector<8x32xf32>
    %241 = arith.truncf %240 : vector<8x32xf32> to vector<8x32xbf16>
    %cst_86 = arith.constant dense<0.000000e+00> : vector<8x32xf32>
    %242 = tpu.matmul %241, %158, %cst_86 {dimension_numbers = #tpu.dot_dimension_numbers<[1], [0], [0], [1], [0, 0, 1, 1], [], []>} : vector<8x32xbf16>, vector<32x32xbf16>, vector<8x32xf32> -> vector<8x32xf32>
    %243 = vector.broadcast %159 : vector<1x32xf32> to vector<8x32xf32>
    %244 = arith.addf %242, %243 : vector<8x32xf32>
    %245 = arith.addf %131, %244 : vector<8x32xf32>
    %c0_87 = arith.constant 0 : index
    %c0_88 = arith.constant 0 : index
    %246 = vector.load %arg19[%c0_87, %c0_88] : memref<1x32xf32, #tpu.memory_space<vmem>>, vector<1x32xf32>
    %c0_89 = arith.constant 0 : index
    %c0_90 = arith.constant 0 : index
    %247 = vector.load %arg20[%c0_89, %c0_90] : memref<1x32xf32, #tpu.memory_space<vmem>>, vector<1x32xf32>
    %cst_91 = arith.constant dense<0.000000e+00> : vector<8xf32>
    %248 = vector.multi_reduction <add>, %245, %cst_91 [1] : vector<8x32xf32> to vector<8xf32>
    %249 = vector.shape_cast %248 : vector<8xf32> to vector<8x1xf32>
    %cst_92 = arith.constant 3.200000e+01 : f32
    %250 = vector.broadcast %cst_92 : f32 to vector<8x1xf32>
    %251 = arith.divf %249, %250 : vector<8x1xf32>
    %252 = vector.broadcast %251 : vector<8x1xf32> to vector<8x32xf32>
    %253 = arith.subf %245, %252 : vector<8x32xf32>
    %254 = arith.mulf %253, %253 : vector<8x32xf32>
    %cst_93 = arith.constant dense<0.000000e+00> : vector<8xf32>
    %255 = vector.multi_reduction <add>, %254, %cst_93 [1] : vector<8x32xf32> to vector<8xf32>
    %256 = vector.shape_cast %255 : vector<8xf32> to vector<8x1xf32>
    %cst_94 = arith.constant 3.200000e+01 : f32
    %257 = vector.broadcast %cst_94 : f32 to vector<8x1xf32>
    %258 = arith.divf %256, %257 : vector<8x1xf32>
    %cst_95 = arith.constant 9.99999996E-13 : f32
    %259 = vector.broadcast %cst_95 : f32 to vector<8x1xf32>
    %260 = arith.addf %258, %259 : vector<8x1xf32>
    %261 = math.rsqrt %260 : vector<8x1xf32>
    %262 = vector.broadcast %261 : vector<8x1xf32> to vector<8x32xf32>
    %263 = arith.mulf %253, %262 : vector<8x32xf32>
    %264 = vector.broadcast %246 : vector<1x32xf32> to vector<8x32xf32>
    %265 = arith.mulf %263, %264 : vector<8x32xf32>
    %266 = vector.broadcast %247 : vector<1x32xf32> to vector<8x32xf32>
    %267 = arith.addf %265, %266 : vector<8x32xf32>
    %268 = arith.truncf %267 : vector<8x32xf32> to vector<8x32xbf16>
    %cst_96 = arith.constant 0.000000e+00 : f32
    %269 = vector.broadcast %cst_96 : f32 to vector<8x32xf32>
    %c0_97 = arith.constant 0 : index
    %c0_98 = arith.constant 0 : index
    %270 = vector.load %arg21[%c0_97, %c0_98] : memref<32x64xbf16, #tpu.memory_space<vmem>>, vector<32x64xbf16>
    %cst_99 = arith.constant dense<0.000000e+00> : vector<8x64xf32>
    %271 = tpu.matmul %268, %270, %cst_99 {dimension_numbers = #tpu.dot_dimension_numbers<[1], [0], [0], [1], [0, 0, 1, 1], [], []>} : vector<8x32xbf16>, vector<32x64xbf16>, vector<8x64xf32> -> vector<8x64xf32>
    %c0_100 = arith.constant 0 : index
    %c0_101 = arith.constant 0 : index
    %272 = vector.load %arg22[%c0_100, %c0_101] : memref<1x64xf32, #tpu.memory_space<vmem>>, vector<1x64xf32>
    %273 = vector.broadcast %272 : vector<1x64xf32> to vector<8x64xf32>
    %274 = arith.addf %271, %273 : vector<8x64xf32>
    %cst_102 = arith.constant 0.000000e+00 : f32
    %275 = vector.broadcast %cst_102 : f32 to vector<8x64xf32>
    %276 = arith.maximumf %274, %275 : vector<8x64xf32>
    %277 = arith.truncf %276 : vector<8x64xf32> to vector<8x64xbf16>
    %c0_103 = arith.constant 0 : index
    %c0_104 = arith.constant 0 : index
    %278 = vector.load %arg23[%c0_103, %c0_104] : memref<64x32xbf16, #tpu.memory_space<vmem>>, vector<64x32xbf16>
    %cst_105 = arith.constant dense<0.000000e+00> : vector<8x32xf32>
    %279 = tpu.matmul %277, %278, %cst_105 {dimension_numbers = #tpu.dot_dimension_numbers<[1], [0], [0], [1], [0, 0, 1, 1], [], []>} : vector<8x64xbf16>, vector<64x32xbf16>, vector<8x32xf32> -> vector<8x32xf32>
    %280 = arith.addf %269, %279 : vector<8x32xf32>
    %c0_106 = arith.constant 0 : index
    %c0_107 = arith.constant 0 : index
    %281 = vector.load %arg24[%c0_106, %c0_107] : memref<1x32xf32, #tpu.memory_space<vmem>>, vector<1x32xf32>
    %282 = vector.broadcast %281 : vector<1x32xf32> to vector<8x32xf32>
    %283 = arith.addf %280, %282 : vector<8x32xf32>
    %284 = arith.addf %245, %283 : vector<8x32xf32>
    %c0_108 = arith.constant 0 : index
    %c0_109 = arith.constant 0 : index
    %c0_110 = arith.constant 0 : index
    %285 = vector.load %arg25[%c0_108, %c0_109, %c0_110] : memref<1x8x32xf32, #tpu.memory_space<vmem>>, vector<1x8x32xf32>
    %286 = vector.shape_cast %285 : vector<1x8x32xf32> to vector<8x32xf32>
    %287 = vector.shape_cast %284 : vector<8x32xf32> to vector<1x8x32xf32>
    tpu.vector_store %arg25[%c0_108, %c0_109, %c0_110], %287 {strides = array<i32>} : memref<1x8x32xf32, #tpu.memory_space<vmem>>, vector<1x8x32xf32>,
    return
  }
  func.func @transform_0(%arg0: i32, %arg1: i32, %arg2: memref<2xi32, #tpu.memory_space<smem>>, %arg3: memref<2xi32, #tpu.memory_space<smem>>) -> (i32, i32, i32) {
    %c0_i32 = arith.constant 0 : i32
    %c0_i32_0 = arith.constant 0 : i32
    return %arg0, %arg1, %c0_i32 : i32, i32, i32
  }
  func.func @transform_1(%arg0: i32, %arg1: i32, %arg2: memref<2xi32, #tpu.memory_space<smem>>, %arg3: memref<2xi32, #tpu.memory_space<smem>>) -> (i32, i32, i32) {
    %c0_i32 = arith.constant 0 : i32
    %c0_i32_0 = arith.constant 0 : i32
    %c0_i32_1 = arith.constant 0 : i32
    return %arg0, %c0_i32, %c0_i32_0 : i32, i32, i32
  }
  func.func @transform_2(%arg0: i32, %arg1: i32, %arg2: memref<2xi32, #tpu.memory_space<smem>>, %arg3: memref<2xi32, #tpu.memory_space<smem>>) -> (i32, i32, i32) {
    %c0_i32 = arith.constant 0 : i32
    %c0_i32_0 = arith.constant 0 : i32
    %c0_i32_1 = arith.constant 0 : i32
    return %arg0, %c0_i32, %c0_i32_0 : i32, i32, i32
  }
  func.func @transform_3(%arg0: i32, %arg1: i32, %arg2: memref<2xi32, #tpu.memory_space<smem>>, %arg3: memref<2xi32, #tpu.memory_space<smem>>) -> (i32, i32) {
    %c0_i32 = arith.constant 0 : i32
    %c0_i32_0 = arith.constant 0 : i32
    %c0_i32_1 = arith.constant 0 : i32
    return %c0_i32, %c0_i32_0 : i32, i32
  }
  func.func @transform_4(%arg0: i32, %arg1: i32, %arg2: memref<2xi32, #tpu.memory_space<smem>>, %arg3: memref<2xi32, #tpu.memory_space<smem>>) -> (i32, i32) {
    %c0_i32 = arith.constant 0 : i32
    %c0_i32_0 = arith.constant 0 : i32
    %c0_i32_1 = arith.constant 0 : i32
    return %c0_i32, %c0_i32_0 : i32, i32
  }
  func.func @transform_5(%arg0: i32, %arg1: i32, %arg2: memref<2xi32, #tpu.memory_space<smem>>, %arg3: memref<2xi32, #tpu.memory_space<smem>>) -> (i32, i32) {
    %c0_i32 = arith.constant 0 : i32
    %c0_i32_0 = arith.constant 0 : i32
    %c0_i32_1 = arith.constant 0 : i32
    return %c0_i32, %c0_i32_0 : i32, i32
  }
  func.func @transform_6(%arg0: i32, %arg1: i32, %arg2: memref<2xi32, #tpu.memory_space<smem>>, %arg3: memref<2xi32, #tpu.memory_space<smem>>) -> (i32, i32) {
    %c0_i32 = arith.constant 0 : i32
    %c0_i32_0 = arith.constant 0 : i32
    %c0_i32_1 = arith.constant 0 : i32
    return %c0_i32, %c0_i32_0 : i32, i32
  }
  func.func @transform_7(%arg0: i32, %arg1: i32, %arg2: memref<2xi32, #tpu.memory_space<smem>>, %arg3: memref<2xi32, #tpu.memory_space<smem>>) -> (i32, i32) {
    %c0_i32 = arith.constant 0 : i32
    %c0_i32_0 = arith.constant 0 : i32
    %c0_i32_1 = arith.constant 0 : i32
    return %c0_i32, %c0_i32_0 : i32, i32
  }
  func.func @transform_8(%arg0: i32, %arg1: i32, %arg2: memref<2xi32, #tpu.memory_space<smem>>, %arg3: memref<2xi32, #tpu.memory_space<smem>>) -> (i32, i32) {
    %c0_i32 = arith.constant 0 : i32
    %c0_i32_0 = arith.constant 0 : i32
    %c0_i32_1 = arith.constant 0 : i32
    return %c0_i32, %c0_i32_0 : i32, i32
  }
  func.func @transform_9(%arg0: i32, %arg1: i32, %arg2: memref<2xi32, #tpu.memory_space<smem>>, %arg3: memref<2xi32, #tpu.memory_space<smem>>) -> (i32, i32) {
    %c0_i32 = arith.constant 0 : i32
    %c0_i32_0 = arith.constant 0 : i32
    %c0_i32_1 = arith.constant 0 : i32
    return %c0_i32, %c0_i32_0 : i32, i32
  }
  func.func @transform_10(%arg0: i32, %arg1: i32, %arg2: memref<2xi32, #tpu.memory_space<smem>>, %arg3: memref<2xi32, #tpu.memory_space<smem>>) -> (i32, i32) {
    %c0_i32 = arith.constant 0 : i32
    %c0_i32_0 = arith.constant 0 : i32
    %c0_i32_1 = arith.constant 0 : i32
    return %c0_i32, %c0_i32_0 : i32, i32
  }
  func.func @transform_11(%arg0: i32, %arg1: i32, %arg2: memref<2xi32, #tpu.memory_space<smem>>, %arg3: memref<2xi32, #tpu.memory_space<smem>>) -> (i32, i32) {
    %c0_i32 = arith.constant 0 : i32
    %c0_i32_0 = arith.constant 0 : i32
    %c0_i32_1 = arith.constant 0 : i32
    return %c0_i32, %c0_i32_0 : i32, i32
  }
  func.func @transform_12(%arg0: i32, %arg1: i32, %arg2: memref<2xi32, #tpu.memory_space<smem>>, %arg3: memref<2xi32, #tpu.memory_space<smem>>) -> (i32, i32) {
    %c0_i32 = arith.constant 0 : i32
    %c0_i32_0 = arith.constant 0 : i32
    %c0_i32_1 = arith.constant 0 : i32
    return %c0_i32, %c0_i32_0 : i32, i32
  }
  func.func @transform_13(%arg0: i32, %arg1: i32, %arg2: memref<2xi32, #tpu.memory_space<smem>>, %arg3: memref<2xi32, #tpu.memory_space<smem>>) -> (i32, i32) {
    %c0_i32 = arith.constant 0 : i32
    %c0_i32_0 = arith.constant 0 : i32
    %c0_i32_1 = arith.constant 0 : i32
    return %c0_i32, %c0_i32_0 : i32, i32
  }
  func.func @transform_14(%arg0: i32, %arg1: i32, %arg2: memref<2xi32, #tpu.memory_space<smem>>, %arg3: memref<2xi32, #tpu.memory_space<smem>>) -> (i32, i32) {
    %c0_i32 = arith.constant 0 : i32
    %c0_i32_0 = arith.constant 0 : i32
    %c0_i32_1 = arith.constant 0 : i32
    return %c0_i32, %c0_i32_0 : i32, i32
  }
  func.func @transform_15(%arg0: i32, %arg1: i32, %arg2: memref<2xi32, #tpu.memory_space<smem>>, %arg3: memref<2xi32, #tpu.memory_space<smem>>) -> (i32, i32) {
    %c0_i32 = arith.constant 0 : i32
    %c0_i32_0 = arith.constant 0 : i32
    %c0_i32_1 = arith.constant 0 : i32
    return %c0_i32, %c0_i32_0 : i32, i32
  }
  func.func @transform_16(%arg0: i32, %arg1: i32, %arg2: memref<2xi32, #tpu.memory_space<smem>>, %arg3: memref<2xi32, #tpu.memory_space<smem>>) -> (i32, i32) {
    %c0_i32 = arith.constant 0 : i32
    %c0_i32_0 = arith.constant 0 : i32
    %c0_i32_1 = arith.constant 0 : i32
    return %c0_i32, %c0_i32_0 : i32, i32
  }
  func.func @transform_17(%arg0: i32, %arg1: i32, %arg2: memref<2xi32, #tpu.memory_space<smem>>, %arg3: memref<2xi32, #tpu.memory_space<smem>>) -> (i32, i32) {
    %c0_i32 = arith.constant 0 : i32
    %c0_i32_0 = arith.constant 0 : i32
    %c0_i32_1 = arith.constant 0 : i32
    return %c0_i32, %c0_i32_0 : i32, i32
  }
  func.func @transform_18(%arg0: i32, %arg1: i32, %arg2: memref<2xi32, #tpu.memory_space<smem>>, %arg3: memref<2xi32, #tpu.memory_space<smem>>) -> (i32, i32) {
    %c0_i32 = arith.constant 0 : i32
    %c0_i32_0 = arith.constant 0 : i32
    %c0_i32_1 = arith.constant 0 : i32
    return %c0_i32, %c0_i32_0 : i32, i32
  }
  func.func @transform_19(%arg0: i32, %arg1: i32, %arg2: memref<2xi32, #tpu.memory_space<smem>>, %arg3: memref<2xi32, #tpu.memory_space<smem>>) -> (i32, i32) {
    %c0_i32 = arith.constant 0 : i32
    %c0_i32_0 = arith.constant 0 : i32
    %c0_i32_1 = arith.constant 0 : i32
    return %c0_i32, %c0_i32_0 : i32, i32
  }
  func.func @transform_20(%arg0: i32, %arg1: i32, %arg2: memref<2xi32, #tpu.memory_space<smem>>, %arg3: memref<2xi32, #tpu.memory_space<smem>>) -> (i32, i32) {
    %c0_i32 = arith.constant 0 : i32
    %c0_i32_0 = arith.constant 0 : i32
    %c0_i32_1 = arith.constant 0 : i32
    return %c0_i32, %c0_i32_0 : i32, i32
  }
  func.func @transform_21(%arg0: i32, %arg1: i32, %arg2: memref<2xi32, #tpu.memory_space<smem>>, %arg3: memref<2xi32, #tpu.memory_space<smem>>) -> (i32, i32, i32) {
    %c0_i32 = arith.constant 0 : i32
    %c0_i32_0 = arith.constant 0 : i32
    return %arg0, %arg1, %c0_i32 : i32, i32, i32
  }
}

</mosaic_0001>

<bundles_post_ra>
// kernel: tpu_custom_call.1
= control target key start
LH: loop header
LB: loop body
LE: loop exit
PB: predicated region body
PF: predicated region fallthrough
CT: control target
= control target key end

     0   :  { %s4362_s0 = inlined_call_operand.hbm [shape: s32[2], index: 0, kind: input, shape index: {}]   ;;  %s4363_s2 = inlined_call_operand.vmem [shape: f32[2,8,32], index: 2, kind: input, shape index: {}]   ;;  %s4364_s3 = inlined_call_operand.hbm [shape: bf16[2,8,64], index: 3, kind: input, shape index: {}]   ;;  %s4365_s4 = inlined_call_operand.vmem [shape: bf16[2,16,64], index: 4, kind: input, shape index: {}]   ;;  %s4366_s5 = inlined_call_operand.hbm [shape: f32[1,32], index: 5, kind: input, shape index: {}]   ;;  %s4367_s6 = inlined_call_operand.hbm [shape: f32[1,32], index: 6, kind: input, shape index: {}]   ;;  %s4368_s7 = inlined_call_operand.vmem [shape: bf16[32,32], index: 7, kind: input, shape index: {}]   ;;  %s4369_s8 = inlined_call_operand.hbm [shape: f32[1,32], index: 8, kind: input, shape index: {}]   ;;  %s4370_s9 = inlined_call_operand.vmem [shape: bf16[32,32], index: 9, kind: input, shape index: {}]   ;;  %s4371_s10 = inlined_call_operand.hbm [shape: f32[1,32], index: 10, kind: input, shape index: {}]   ;;  %s4372_s11 = inlined_call_operand.hbm [shape: f32[1,32], index: 11, kind: input, shape index: {}]   ;;  %s4373_s12 = inlined_call_operand.hbm [shape: f32[1,32], index: 12, kind: input, shape index: {}]   ;;  %s4374_s13 = inlined_call_operand.vmem [shape: bf16[32,32], index: 13, kind: input, shape index: {}]   ;;  %s4375_s14 = inlined_call_operand.hbm [shape: f32[1,32], index: 14, kind: input, shape index: {}]   ;;  %s4376_s15 = inlined_call_operand.hbm [shape: bf16[32,32], index: 15, kind: input, shape index: {}]   ;;  %s4377_s16 = inlined_call_operand.hbm [shape: f32[1,32], index: 16, kind: input, shape index: {}]   ;;  %s4378_s17 = inlined_call_operand.hbm [shape: f32[1,32], index: 17, kind: input, shape index: {}]   ;;  %s4379_s18 = inlined_call_operand.vmem [shape: f32[1,32], index: 18, kind: input, shape index: {}]   ;;  %s4380_s19 = inlined_call_operand.vmem [shape: bf16[32,64], index: 19, kind: input, shape index: {}]   ;;  %s4381_s20 = inlined_call_operand.vmem [shape: f32[1,64], index: 20, kind: input, shape index: {}]   ;;  %s4382_s21 = inlined_call_operand.vmem [shape: bf16[64,32], index: 21, kind: input, shape index: {}]   ;;  %s4383_s22 = inlined_call_operand.vmem [shape: f32[1,32], index: 22, kind: input, shape index: {}]   ;;  %s4384_s23 = inlined_call_operand.hbm [shape: f32[2,8,32], index: 23, kind: output, shape index: {}]   ;;  %s4385_s1 = inlined_call_operand.hbm [shape: s32[2], index: 1, kind: input, shape index: {}]  }
   0x1   :  { %4409 = sst [smem:[#allocation32_spill]] %s4362_s0 }
   0x2   :  { %4410 = sst [smem:[#allocation33_spill]] %s4363_s2  ;;  %s4428_s24 = sld [smem:[#allocation32_spill]] }
   0x3   :  { %4411 = sst [smem:[#allocation34_spill]] %s4364_s3 }
   0x4   :  { %4412 = sst [smem:[#allocation35_spill]] %s4365_s4 }
   0x5   :  { %4413 = sst [smem:[#allocation36_spill]] %s4366_s5 }
   0x6   :  { %4414 = sst [smem:[#allocation37_spill]] %s4367_s6 }
   0x7   :  { %4415 = sst [smem:[#allocation38_spill]] %s4368_s7 }
   0x8   :  { %4416 = sst [smem:[#allocation39_spill]] %s4369_s8 }
   0x9   :  { %4417 = sst [smem:[#allocation40_spill]] %s4370_s9 }
   0xa   :  { %4418 = sst [smem:[#allocation41_spill]] %s4371_s10 }
   0xb   :  { %4419 = sst [smem:[#allocation42_spill]] %s4372_s11 }
   0xc   :  { %4420 = sst [smem:[#allocation43_spill]] %s4373_s12 }
   0xd   :  { %4421 = sst [smem:[#allocation44_spill]] %s4374_s13 }
   0xe   :  { %4422 = sst [smem:[#allocation45_spill]] %s4379_s18  ;;  %s3058_s18 = scalar_lea.hbm %s4428_s24, 16 }
   0xf   :  { %4423 = sst [smem:[#allocation46_spill]] %s4380_s19  ;;  %p3059_p0 = scmp.ne.s32.totalorder %s4428_s24, %s3058_s18 }
  0x10   :  { %4424 = sst [smem:[#allocation47_spill]] %s4381_s20  ;;  %p3062_p1 = scmp.lt.u32.totalorder %s3058_s18, %s4428_s24 }
  0x11   :  { %4425 = sst [smem:[#allocation48_spill]] %s4382_s21 }
  0x12   :  { %4426 = sst [smem:[#allocation49_spill]] %s4383_s22  ;;  %p3064_p2 = pnand %p3062_p1, %p3059_p0 }
  0x13   :  { %4427 = sst [smem:[#allocation50_spill]] %s4384_s23 }
  0x14   :  { %3067 = shalt.err (!%p3064_p2)  }
  0x15   :  { %s3494_s3 = smov [#allocation3]   ;;  %s3068_s29 = scalar_lea.hbm %s4385_s1, 16 }
  0x16   :  { %29 = dma.hbm_to_smem %s4428_s24, 16, %s3494_s3, [#allocation2] }
  0x17   :  { %p3069_p3 = scmp.ne.s32.totalorder %s4385_s1, %s3068_s29  ;;  %p3072_p4 = scmp.lt.u32.totalorder %s3068_s29, %s4385_s1 }
  0x19   :  { %p3074_p5 = pnand %p3072_p4, %p3069_p3 }
  0x1b   :  { %3077 = shalt.err (!%p3074_p5)  }
  0x1c   :  { %s3495_s18 = smov [#allocation4]  }
  0x1d   :  { %31 = dma.hbm_to_smem %s4385_s1, 16, %s3495_s18, [#allocation2] }
  0x1e   :  { %3440 = dma.done.wait [#allocation2], 32 }
  0x1f   :  { %3441 = vsyncadd [#allocation2], 4294967264 }
  0x20   :  { %33 = sfence }
  0x21   :  { %34 = vsyncpa [#allocation6], 0 }
  0x22   :  { %36 = vsyncpa [#allocation6 + $0x1], 0 }
  0x23   :  { %37 = vsyncpa [#allocation9], 0 }
  0x24   :  { %38 = vsyncpa [#allocation12], 0 }
  0x25   :  { %39 = vsyncpa [#allocation15], 0 }
  0x26   :  { %40 = vsyncpa [#allocation18], 0 }
  0x27   :  { %41 = vsyncpa [#allocation21], 0 }
  0x28   :  { %42 = vsyncpa [#allocation7], 0 }
  0x29   :  { %44 = vsyncpa [#allocation7 + $0x1], 0  ;;  %s3666_s24 = smov 0   ;;  %s3668_s2 = smov 0  }
  0x2a   :  { %s3670_s26 = smov 0   ;;  %s3672_s3 = smov 0  }
  0x2b   :  { %s3674_s1 = smov 0   ;;  %s3676_s7 = smov 0  }
  0x2c LB: > { %s4392_s27 = sadd.s32 4294967295, %s3492_s7   ;;  %p2540_p6 = scmp.ge.s32.totalorder %s3492_s7, 1  ;;  %s3492_s7 = sphi %s3676_s7, %s50_s7   ;;  %s3488_s1 = sphi %s3674_s1, %s4474_s1   ;;  %s3484_s3 = sphi %s3672_s3, %s4473_s3   ;;  %s3480_s26 = sphi %s3670_s26, %s4472_s26   ;;  %s3476_s2 = sphi %s3668_s2, %s4471_s2   ;;  %s3472_s24 = sphi %s3666_s24, %s4470_s24  }
  0x2d   : > { %p3700_p7 = scmp.eq.s32.totalorder %s4392_s27, 0  ;;  %p553_p8 = scmp.lt.s32.totalorder %s3492_s7, 3 }
  0x2e   : > { %s3496_s29 = smov [#allocation8]   ;;  %s3497_s0 = smov [#allocation11]  }
  0x2f   : > { %s4429_s8 = scalar_select %p3700_p7, 1, 0 }
  0x30   : > { %p3705_p9 = pnand %p2540_p6, %p553_p8  ;;  %s566_s4 = sshll.u32 %s3496_s29, 4  ;;  %s567_s4 = int_to_ptr.vmem [resolvable:$true] %s566_s4 }
  0x31   : > { %s591_s5 = sshll.u32 %s3497_s0, 4  ;;  %s3498_s18 = smov [#allocation14]   ;;  %s3718_s5 = int_to_ptr.vmem [resolvable:$true] %s591_s5 }
  0x32   : > { %s4430_s28 = scalar_select %p3705_p9, 1, 0 }
  0x33   : > { %p2869_p11 = pneg %p3705_p9  ;;  %s616_s25 = sshll.u32 %s3498_s18, 4  ;;  %s3720_s25 = int_to_ptr.vmem [resolvable:$true] %s616_s25 }
  0x34   : > { %s4432_s27 = sld [smem:[#allocation36_spill]] }
  0x35   : > { %p3714_p12 = pnand %p2869_p11, %p3700_p7 }
  0x37   : > { %p3730_p0 = pneg %p3714_p12 }
  0x3a   : > { %s3078_s23 = scalar_lea.hbm %s4432_s27, 16 }
  0x3b   : > { %p3079_p13 = scmp.ne.s32.totalorder %s4432_s27, %s3078_s23  ;;  %p3085_p3 = scmp.lt.u32.totalorder %s3078_s23, %s4432_s27 }
  0x3d   : > { %p3081_p1 = pnand %p3730_p0, %p3079_p13 }
  0x3f   : > { %p3082_p2 = pneg %p3081_p1 }
  0x41   : > { %p3087_p4 = pnand %p3085_p3, %p3082_p2 }
  0x43   : > { %3090 = shalt.err (!%p3087_p4)
}
  0x44   : > { %s3091_s6 = scalar_lea.vmem %s567_s4, 16  ;;  %s3098_s20 = scalar_lea.vmem %s567_s4, 32 }
  0x45   : > { %p3092_p5 = scmp.ne.s32.totalorder %s567_s4, %s3091_s6  ;;  %p3099_p11 = scmp.lt.s32.totalorder %s567_s4, %s567_s4 }
  0x46   : > { %p3100_p10 = scmp.lt.s32.totalorder %s3098_s20, %s3091_s6 }
  0x47   : > { %p3094_p6 = pnand %p3092_p5, %p3730_p0 }
  0x48   : > { %p3101_p9 = por %p3100_p10, %p3099_p11 }
  0x49   : > { %p3095_p8 = pneg %p3094_p6 }
  0x4b   : > { %p3102_p7 = pnand %p3101_p9, %p3095_p8 }
  0x4d   : > { %3105 = shalt.err (!%p3102_p7)
}
  0x4e   : > { %2872 = dma.hbm_to_vmem [thread:$0]  (!%p3714_p12), %s4432_s27, 16, %s567_s4, [#allocation9]  }
  0x4f   : > { %s4434_s18 = sld [smem:[#allocation39_spill]] }
  0x55   : > { %s3106_s19 = scalar_lea.hbm %s4434_s18, 16 }
  0x56   : > { %p3107_p13 = scmp.ne.s32.totalorder %s4434_s18, %s3106_s19  ;;  %p3113_p7 = scmp.lt.u32.totalorder %s3106_s19, %s4434_s18 }
  0x58   : > { %p3109_p1 = pnand %p3107_p13, %p3730_p0 }
  0x5a   : > { %p3110_p10 = pneg %p3109_p1 }
  0x5c   : > { %p3115_p9 = pnand %p3113_p7, %p3110_p10 }
  0x5e   : > { %3118 = shalt.err (!%p3115_p9)
}
  0x5f   : > { %s3119_s4 = scalar_lea.vmem %s3718_s5, 16  ;;  %s3126_s9 = scalar_lea.vmem %s3718_s5, 32 }
  0x60   : > { %p3120_p2 = scmp.ne.s32.totalorder %s3718_s5, %s3119_s4  ;;  %p3127_p5 = scmp.lt.s32.totalorder %s3718_s5, %s3718_s5 }
  0x61   : > { %p3128_p6 = scmp.lt.s32.totalorder %s3126_s9, %s3119_s4 }
  0x62   : > { %p3122_p3 = pnand %p3120_p2, %p3730_p0 }
  0x63   : > { %p3129_p8 = por %p3128_p6, %p3127_p5 }
  0x64   : > { %p3123_p4 = pneg %p3122_p3 }
  0x66   : > { %p3130_p11 = pnand %p3129_p8, %p3123_p4 }
  0x68   : > { %3133 = shalt.err (!%p3130_p11)
}
  0x69   : > { %2878 = dma.hbm_to_vmem [thread:$0]  (!%p3714_p12), %s4434_s18, 16, %s3718_s5, [#allocation12]  }
  0x6a   : > { %s4435_s11 = sld [smem:[#allocation42_spill]] }
  0x70   : > { %s3134_s21 = scalar_lea.hbm %s4435_s11, 16 }
  0x71   : > { %p3135_p13 = scmp.ne.s32.totalorder %s4435_s11, %s3134_s21  ;;  %p3141_p7 = scmp.lt.u32.totalorder %s3134_s21, %s4435_s11 }
  0x73   : > { %p3137_p1 = pnand %p3135_p13, %p3730_p0 }
  0x75   : > { %p3138_p10 = pneg %p3137_p1 }
  0x77   : > { %p3143_p9 = pnand %p3141_p7, %p3138_p10 }
  0x79   : > { %3146 = shalt.err (!%p3143_p9)
}
  0x7a   : > { %s3147_s5 = scalar_lea.vmem %s3720_s25, 16  ;;  %s3154_s9 = scalar_lea.vmem %s3720_s25, 32 }
  0x7b   : > { %p3148_p2 = scmp.ne.s32.totalorder %s3720_s25, %s3147_s5  ;;  %p3155_p5 = scmp.lt.s32.totalorder %s3720_s25, %s3720_s25 }
  0x7c   : > { %p3156_p6 = scmp.lt.s32.totalorder %s3154_s9, %s3147_s5 }
  0x7d   : > { %p3150_p3 = pnand %p3148_p2, %p3730_p0 }
  0x7e   : > { %p3157_p8 = por %p3156_p6, %p3155_p5 }
  0x7f   : > { %p3151_p4 = pneg %p3150_p3 }
  0x81   : > { %p3158_p11 = pnand %p3157_p8, %p3151_p4 }
  0x83   : > { %3161 = shalt.err (!%p3158_p11)
}
  0x84   : > { %2884 = dma.hbm_to_vmem [thread:$0]  (!%p3714_p12), %s4435_s11, 16, %s3720_s25, [#allocation15]  }
  0x85   : > { %s3499_s22 = smov [#allocation17]   ;;  %s3500_s21 = smov [#allocation20]  }
  0x86   : > { %s641_s29 = sshll.u32 %s3499_s22, 4  ;;  %s665_s23 = sshll.u32 %s3500_s21, 4  ;;  %s642_s29 = int_to_ptr.vmem [resolvable:$true] %s641_s29  ;;  %s666_s23 = int_to_ptr.vmem [resolvable:$true] %s665_s23 }
  0x87   : > { %s3162_s4 = scalar_lea.hbm %s4375_s14, 16 }
  0x88   : > { %p3163_p13 = scmp.ne.s32.totalorder %s4375_s14, %s3162_s4  ;;  %p3169_p7 = scmp.lt.u32.totalorder %s3162_s4, %s4375_s14 }
  0x8a   : > { %p3165_p1 = pnand %p3163_p13, %p3730_p0 }
  0x8c   : > { %p3166_p10 = pneg %p3165_p1 }
  0x8e   : > { %p3171_p9 = pnand %p3169_p7, %p3166_p10 }
  0x90   : > { %3174 = shalt.err (!%p3171_p9)
}
  0x91   : > { %s3175_s25 = scalar_lea.vmem %s642_s29, 16  ;;  %s3182_s19 = scalar_lea.vmem %s642_s29, 32 }
  0x92   : > { %p3176_p2 = scmp.ne.s32.totalorder %s642_s29, %s3175_s25  ;;  %p3183_p5 = scmp.lt.s32.totalorder %s642_s29, %s642_s29 }
  0x93   : > { %p3184_p6 = scmp.lt.s32.totalorder %s3182_s19, %s3175_s25 }
  0x94   : > { %p3178_p3 = pnand %p3176_p2, %p3730_p0 }
  0x95   : > { %p3185_p8 = por %p3184_p6, %p3183_p5 }
  0x96   : > { %p3179_p4 = pneg %p3178_p3 }
  0x98   : > { %p3186_p11 = pnand %p3185_p8, %p3179_p4 }
  0x9a   : > { %3189 = shalt.err (!%p3186_p11)
}
  0x9b   : > { %2890 = dma.hbm_to_vmem [thread:$0]  (!%p3714_p12), %s4375_s14, 16, %s642_s29, [#allocation18]  }
  0x9c   : > { %s3190_s20 = scalar_lea.hbm %s4377_s16, 16 }
  0x9d   : > { %p3191_p13 = scmp.ne.s32.totalorder %s4377_s16, %s3190_s20  ;;  %p3197_p7 = scmp.lt.u32.totalorder %s3190_s20, %s4377_s16 }
  0x9f   : > { %p3193_p1 = pnand %p3191_p13, %p3730_p0 }
  0xa1   : > { %p3194_p10 = pneg %p3193_p1 }
  0xa3   : > { %p3199_p9 = pnand %p3197_p7, %p3194_p10 }
  0xa5   : > { %3202 = shalt.err (!%p3199_p9)
}
  0xa6   : > { %s3203_s25 = scalar_lea.vmem %s666_s23, 16  ;;  %s3210_s29 = scalar_lea.vmem %s666_s23, 32 }
  0xa7   : > { %p3204_p2 = scmp.ne.s32.totalorder %s666_s23, %s3203_s25  ;;  %p3211_p5 = scmp.lt.s32.totalorder %s666_s23, %s666_s23 }
  0xa8   : > { %p3212_p6 = scmp.lt.s32.totalorder %s3210_s29, %s3203_s25 }
  0xa9   : > { %p3206_p3 = pnand %p3204_p2, %p3730_p0 }
  0xaa   : > { %p3213_p8 = por %p3212_p6, %p3211_p5 }
  0xab   : > { %p3207_p4 = pneg %p3206_p3 }
  0xad   : > { %p3214_p11 = pnand %p3213_p8, %p3207_p4 }
  0xaf   : > { %3217 = shalt.err (!%p3214_p11)
}
  0xb0   : > { %2896 = dma.hbm_to_vmem [thread:$0]  (!%p3714_p12), %s4377_s16, 16, %s666_s23, [#allocation21]  }
  0xb1   : > { %s3501_s21 = smov [#allocation10]   ;;  %s3502_s6 = smov [#allocation13]  }
  0xb2   : > { %s577_s18 = sshll.u32 %s3501_s21, 4  ;;  %s605_s20 = sshll.u32 %s3502_s6, 4  ;;  %s578_s18 = int_to_ptr.vmem [resolvable:$true] %s577_s18  ;;  %s606_s20 = int_to_ptr.vmem [resolvable:$true] %s605_s20 }
  0xb3   : > { %s4436_s9 = sld [smem:[#allocation37_spill]] }
  0xb9   : > { %s3218_s13 = scalar_lea.hbm %s4436_s9, 16 }
  0xba   : > { %p3219_p13 = scmp.ne.s32.totalorder %s4436_s9, %s3218_s13  ;;  %p3225_p7 = scmp.lt.u32.totalorder %s3218_s13, %s4436_s9 }
  0xbc   : > { %p3221_p1 = pnand %p3219_p13, %p3730_p0 }
  0xbe   : > { %p3222_p10 = pneg %p3221_p1 }
  0xc0   : > { %p3227_p9 = pnand %p3225_p7, %p3222_p10 }
  0xc2   : > { %3230 = shalt.err (!%p3227_p9)
}
  0xc3   : > { %s3231_s23 = scalar_lea.vmem %s578_s18, 16  ;;  %s3238_s22 = scalar_lea.vmem %s578_s18, 32 }
  0xc4   : > { %p3232_p2 = scmp.ne.s32.totalorder %s578_s18, %s3231_s23  ;;  %p3239_p5 = scmp.lt.s32.totalorder %s578_s18, %s578_s18 }
  0xc5   : > { %p3240_p6 = scmp.lt.s32.totalorder %s3238_s22, %s3231_s23 }
  0xc6   : > { %p3234_p3 = pnand %p3232_p2, %p3730_p0 }
  0xc7   : > { %p3241_p8 = por %p3240_p6, %p3239_p5 }
  0xc8   : > { %p3235_p4 = pneg %p3234_p3 }
  0xca   : > { %p3242_p11 = pnand %p3241_p8, %p3235_p4 }
  0xcc   : > { %3245 = shalt.err (!%p3242_p11)
}
  0xcd   : > { %2875 = dma.hbm_to_vmem [thread:$0]  (!%p3714_p12), %s4436_s9, 16, %s578_s18, [#allocation9]  }
  0xce   : > { %s4437_s10 = sld [smem:[#allocation41_spill]] }
  0xd4   : > { %s3246_s5 = scalar_lea.hbm %s4437_s10, 16 }
  0xd5   : > { %p3247_p13 = scmp.ne.s32.totalorder %s4437_s10, %s3246_s5  ;;  %p3253_p7 = scmp.lt.u32.totalorder %s3246_s5, %s4437_s10 }
  0xd7   : > { %p3249_p1 = pnand %p3247_p13, %p3730_p0 }
  0xd9   : > { %p3250_p10 = pneg %p3249_p1 }
  0xdb   : > { %p3255_p9 = pnand %p3253_p7, %p3250_p10 }
  0xdd   : > { %3258 = shalt.err (!%p3255_p9)
}
  0xde   : > { %s3259_s23 = scalar_lea.vmem %s606_s20, 16  ;;  %s3266_s18 = scalar_lea.vmem %s606_s20, 32 }
  0xdf   : > { %p3260_p2 = scmp.ne.s32.totalorder %s606_s20, %s3259_s23  ;;  %p3267_p5 = scmp.lt.s32.totalorder %s606_s20, %s606_s20 }
  0xe0   : > { %p3268_p6 = scmp.lt.s32.totalorder %s3266_s18, %s3259_s23 }
  0xe1   : > { %p3262_p3 = pnand %p3260_p2, %p3730_p0 }
  0xe2   : > { %p3269_p8 = por %p3268_p6, %p3267_p5 }
  0xe3   : > { %p3263_p4 = pneg %p3262_p3 }
  0xe5   : > { %p3270_p11 = pnand %p3269_p8, %p3263_p4 }
  0xe7   : > { %3273 = shalt.err (!%p3270_p11)
}
  0xe8   : > { %2881 = dma.hbm_to_vmem [thread:$0]  (!%p3714_p12), %s4437_s10, 16, %s606_s20, [#allocation12]  }
  0xe9   : > { %s3503_s6 = smov [#allocation16]   ;;  %s3504_s4 = smov [#allocation19]  }
  0xea   : > { %s627_s11 = sshll.u32 %s3503_s6, 4  ;;  %s651_s5 = sshll.u32 %s3504_s4, 4  ;;  %s628_s11 = int_to_ptr.vmem [resolvable:$true] %s627_s11  ;;  %s652_s5 = int_to_ptr.vmem [resolvable:$true] %s651_s5 }
  0xeb   : > { %s4438_s12 = sld [smem:[#allocation43_spill]] }
  0xf1   : > { %s3274_s29 = scalar_lea.hbm %s4438_s12, 16 }
  0xf2   : > { %p3275_p13 = scmp.ne.s32.totalorder %s4438_s12, %s3274_s29  ;;  %p3281_p7 = scmp.lt.u32.totalorder %s3274_s29, %s4438_s12 }
  0xf4   : > { %p3277_p1 = pnand %p3275_p13, %p3730_p0 }
  0xf6   : > { %p3278_p10 = pneg %p3277_p1 }
  0xf8   : > { %p3283_p9 = pnand %p3281_p7, %p3278_p10 }
  0xfa   : > { %3286 = shalt.err (!%p3283_p9)
}
  0xfb   : > { %s3287_s20 = scalar_lea.vmem %s628_s11, 16  ;;  %s3294_s21 = scalar_lea.vmem %s628_s11, 32 }
  0xfc   : > { %p3288_p2 = scmp.ne.s32.totalorder %s628_s11, %s3287_s20  ;;  %p3295_p5 = scmp.lt.s32.totalorder %s628_s11, %s628_s11 }
  0xfd   : > { %p3296_p6 = scmp.lt.s32.totalorder %s3294_s21, %s3287_s20 }
  0xfe   : > { %p3290_p3 = pnand %p3288_p2, %p3730_p0 }
  0xff   : > { %p3297_p8 = por %p3296_p6, %p3295_p5 }
 0x100   : > { %p3291_p4 = pneg %p3290_p3 }
 0x102   : > { %p3298_p11 = pnand %p3297_p8, %p3291_p4 }
 0x104   : > { %3301 = shalt.err (!%p3298_p11)
}
 0x105   : > { %2887 = dma.hbm_to_vmem [thread:$0]  (!%p3714_p12), %s4438_s12, 16, %s628_s11, [#allocation15]  }
 0x106   : > { %s3302_s29 = scalar_lea.hbm %s4376_s15, 256 }
 0x107   : > { %p3303_p13 = scmp.ne.s32.totalorder %s4376_s15, %s3302_s29  ;;  %p3309_p7 = scmp.lt.u32.totalorder %s3302_s29, %s4376_s15 }
 0x109   : > { %p3305_p1 = pnand %p3303_p13, %p3730_p0 }
 0x10b   : > { %p3306_p10 = pneg %p3305_p1 }
 0x10d   : > { %p3311_p9 = pnand %p3309_p7, %p3306_p10 }
 0x10f   : > { %3314 = shalt.err (!%p3311_p9)
}
 0x110   : > { %s3315_s20 = scalar_lea.vmem %s652_s5, 256  ;;  %p3323_p5 = scmp.lt.s32.totalorder %s652_s5, %s652_s5 }
 0x111   : > { %p3316_p2 = scmp.ne.s32.totalorder %s652_s5, %s3315_s20  ;;  %p3324_p6 = scmp.lt.s32.totalorder %s3315_s20, %s3315_s20 }
 0x113   : > { %p3318_p3 = pnand %p3316_p2, %p3730_p0  ;;  %p3325_p8 = por %p3324_p6, %p3323_p5 }
 0x115   : > { %p3319_p4 = pneg %p3318_p3 }
 0x117   : > { %p3326_p11 = pnand %p3325_p8, %p3319_p4 }
 0x119   : > { %3329 = shalt.err (!%p3326_p11)
}
 0x11a   : > { %s3505_s11 = smov 64   ;;  %s3506_s21 = smov 4  }
 0x11b   : > { %2893 = dma.hbm_to_vmem [thread:$0]  (!%p3714_p12), %s4376_s15, 256, %s652_s5, [#allocation18], %s3505_s11, %s3505_s11, %s3506_s21  }
 0x11c   : > { %s3507_s13 = smov [#allocation22]   ;;  %s3330_s23 = scalar_lea.hbm %s4378_s17, 16 }
 0x11d   : > { %s676_s25 = sshll.u32 %s3507_s13, 4  ;;  %p3331_p13 = scmp.ne.s32.totalorder %s4378_s17, %s3330_s23  ;;  %s677_s25 = int_to_ptr.vmem [resolvable:$true] %s676_s25 }
 0x11e   : > { %p3337_p7 = scmp.lt.u32.totalorder %s3330_s23, %s4378_s17 }
 0x11f   : > { %p3333_p1 = pnand %p3331_p13, %p3730_p0 }
 0x121   : > { %p3334_p10 = pneg %p3333_p1 }
 0x123   : > { %p3339_p9 = pnand %p3337_p7, %p3334_p10 }
 0x125   : > { %3342 = shalt.err (!%p3339_p9)
}
 0x126   : > { %s3343_s5 = scalar_lea.vmem %s677_s25, 16  ;;  %s3350_s11 = scalar_lea.vmem %s677_s25, 32 }
 0x127   : > { %p3344_p2 = scmp.ne.s32.totalorder %s677_s25, %s3343_s5  ;;  %p3351_p5 = scmp.lt.s32.totalorder %s677_s25, %s677_s25 }
 0x128   : > { %p3352_p6 = scmp.lt.s32.totalorder %s3350_s11, %s3343_s5 }
 0x129   : > { %p3346_p3 = pnand %p3344_p2, %p3730_p0 }
 0x12a   : > { %p3353_p8 = por %p3352_p6, %p3351_p5 }
 0x12b   : > { %p3347_p4 = pneg %p3346_p3 }
 0x12d   : > { %p3354_p11 = pnand %p3353_p8, %p3347_p4 }
 0x12f   : > { %3357 = shalt.err (!%p3354_p11)
}
 0x130   : > { %2899 = dma.hbm_to_vmem [thread:$0]  (!%p3714_p12), %s4378_s17, 16, %s677_s25, [#allocation21]  }
 0x131   : > { %s2539_s0 = sadd.s32 4294967294, %s3492_s7   ;;  %s62_s9 = sadd.s32 1, %s3488_s1 }
 0x132   : > { %p64_p0 = scmp.ge.s32.totalorder %s62_s9, 2  ;;  %s97_s30 = sadd.s32 1, %s3480_s26 }
 0x133   : > { %p104_p13 = scmp.ne.s32.totalorder %s3480_s26, %s3476_s2  ;;  %p105_p1 = scmp.eq.s32.totalorder %s3492_s7, 0 }
 0x134   : > { %s4476_s9 = smov (%p64_p0, %s62_s9), 0  ;;  %p110_p7 = scmp.ne.s32.totalorder %s3476_s2, %s3472_s24 }
 0x135   : > { %p3928_p10 = por %p105_p1, %p104_p13  ;;  %s94_s13 = ssub.s32 %s3488_s1, %s4476_s9 }
 0x136   : > { %s4440_s25 = sadd.s32 4294967295, %s3492_s7   ;;  %p95_p9 = scmp.eq.s32.totalorder %s94_s13, 0 }
 0x137   : > { %p540_p12 = scmp.eq.s32.totalorder %s4440_s25, 1  ;;  %p4441_p2 = scmp.ne.s32.totalorder %s4429_s8, 0 }
 0x138   : > { %p546_p5 = scmp.eq.s32.totalorder %s2539_s0, 1  ;;  %p2918_p8 = scmp.lt.s32.totalorder %s3492_s7, 2 }
 0x139   : > { %p3940_p3 = por %p4441_p2, %p110_p7  ;;  %p3944_p4 = por %p540_p12, %p104_p13 }
 0x13a   : > { %s3949_s23 = scalar_select %p95_p9, %s3480_s26, %s97_s30  }
 0x13b   : > { %s4443_s19 = scalar_select %p3944_p4, 1, 0 }
 0x13c   : > { %p3951_p6 = por %p546_p5, %p110_p7  ;;  %s712_s22 = sand.u32 1, %s3480_s26  }
 0x13d   : > { %s2553_s20 = sshll.u32 %s3488_s1, 6  ;;  %s2552_s5 = sshll.u32 %s712_s22, 2 }
 0x13e   : > { %s4444_s18 = scalar_select %p3951_p6, 1, 0 }
 0x13f   : > { %s4445_s6 = sld [smem:[#allocation34_spill]]  ;;  %s716_s0 = scalar_lea.vmem [#allocation5], %s2552_s5 }
 0x140   : > { %s723_s30 = sshll.u32 %s716_s0, 4  ;;  %p3965_p11 = pnand %p2918_p8, %p3928_p10  ;;  %s3969_s30 = int_to_ptr.vmem [resolvable:$true] %s723_s30 }
 0x141   : > { %s713_s10 = scalar_lea.sflag [#allocation6], %s712_s22 }
 0x142   : > { %p3360_p13 = pneg %p3965_p11 }
 0x145   : > { %s3961_s13 = scalar_lea.hbm %s4445_s6, %s2553_s20  ;;  %s3363_s4 = scalar_lea.hbm %s4445_s6, 128 }
 0x146   : > { %s3358_s12 = scalar_lea.hbm %s3961_s13, 64  ;;  %p3364_p10 = scmp.lt.u32.totalorder %s3961_s13, %s4445_s6 }
 0x147   : > { %p3359_p0 = scmp.ne.s32.totalorder %s3961_s13, %s3358_s12  ;;  %p3365_p12 = scmp.lt.u32.totalorder %s3363_s4, %s3358_s12 }
 0x148   : > { %p3367_p2 = scmp.lt.u32.totalorder %s3358_s12, %s3961_s13 }
 0x149   : > { %p3361_p1 = pnand %p3360_p13, %p3359_p0  ;;  %p3366_p9 = por %p3365_p12, %p3364_p10 }
 0x14b   : > { %p3362_p7 = pneg %p3361_p1  ;;  %p3368_p5 = por %p3367_p2, %p3366_p9 }
 0x14d   : > { %p3369_p8 = pnand %p3368_p5, %p3362_p7 }
 0x14f   : > { %3372 = shalt.err (!%p3369_p8)
}
 0x150   : > { %s3373_s22 = scalar_lea.vmem %s3969_s30, 64  ;;  %s3508_s0 = smov [#allocation5]  }
 0x151   : > { %p3374_p0 = scmp.ne.s32.totalorder %s3969_s30, %s3373_s22  ;;  %s3378_s20 = sshll.u32 %s3508_s0, 4  ;;  %s3379_s20 = int_to_ptr.vmem [resolvable:$false] %s3378_s20 }
 0x152   : > { %s3380_s5 = scalar_lea.vmem %s3379_s20, 128  ;;  %p3381_p4 = scmp.lt.s32.totalorder %s3969_s30, %s3379_s20 }
 0x153   : > { %p3376_p1 = pnand %p3374_p0, %p3360_p13  ;;  %p3382_p10 = scmp.lt.s32.totalorder %s3380_s5, %s3373_s22 }
 0x155   : > { %p3377_p6 = pneg %p3376_p1  ;;  %p3383_p12 = por %p3382_p10, %p3381_p4 }
 0x157   : > { %p3384_p9 = pnand %p3383_p12, %p3377_p6 }
 0x159   : > { %3387 = shalt.err (!%p3384_p9)
}
 0x15a   : > { %2903 = dma.hbm_to_vmem [thread:$0]  (!%p3965_p11), %s3961_s13, 64, %s3969_s30, %s713_s10  }
 0x15b   : > { %p4447_p7 = scmp.ne.s32.totalorder %s4430_s28, 0 }
 0x15c   : > { %s3999_s12 = sand.u32 (!%p4447_p7), 1, %s3476_s2  }
 0x15d   : > { %740 = sbr.rel (%p4447_p7) target bundleno = 4663 (0x1237), region = 104  ;;  %s2555_s4 = sshll.u32 (!%p4447_p7), %s3999_s12, 2 }
 0x15e   : > { %s743_s11 = scalar_lea.sflag (!%p4447_p7), [#allocation6], %s3999_s12  ;;  %s4003_s21 = scalar_lea.vmem (!%p4447_p7), [#allocation5], %s2555_s4 }
 0x164   : > { %3443 = dma.done.wait (%p3940_p3), %s743_s11, 64  }
 0x165   : > { %3445 = vsyncadd (%p3940_p3), %s743_s11, 4294967232  ;;  %p4448_p4 = scmp.ne.s32.totalorder %s4429_s8, 0 }
 0x167   : > { %3447 = dma.done.wait (%p4448_p4), [#allocation9], 32  }
 0x168   : > { %3449 = vsyncadd (%p4448_p4), [#allocation9], 4294967264 }
 0x169   : > { %3451 = dma.done.wait (%p4448_p4), [#allocation12], 32  }
 0x16a   : > { %3453 = vsyncadd (%p4448_p4), [#allocation12], 4294967264 }
 0x16b   : > { %3455 = dma.done.wait (%p4448_p4), [#allocation15], 32  }
 0x16c   : > { %3457 = vsyncadd (%p4448_p4), [#allocation15], 4294967264 }
 0x16d   : > { %3459 = dma.done.wait (%p4448_p4), [#allocation18], 272  }
 0x16e   : > { %3461 = vsyncadd (%p4448_p4), [#allocation18], 4294967024 }
 0x16f   : > { %3463 = dma.done.wait (%p4448_p4), [#allocation21], 32  }
 0x170   : > { %3465 = vsyncadd (%p4448_p4), [#allocation21], 4294967264  ;;  %p857_p3 = scmp.lt.s32.totalorder %s3484_s3, 1  ;;  %s4449_s30 = sld [smem:[#allocation33_spill]]  ;;  %vm888_vm0 = vcmask 261120   ;;  %v3509_v8 = vmov 0.0   ;;  %v874_v40 = vlaneseq }
 0x171   : > { %s4450_s20 = sld [smem:[#allocation35_spill]]  ;;  %s4451_s11 = sld [smem:[#allocation38_spill]]  ;;  %2677 = vmatprep.subr.bf16.mxu0 %v3509_v8  ;;  %vm3510_vm1 = vmmov 0   ;;  %2685 = vmatprep.subr.bf16.mxu1 %v3509_v8  ;;  %v917_v10 = vld [vmem:[%s4003_s21] sm:$0xf]  ;;  %vm992_vm2 = vcmask 64512  }
 0x172   : > { %s858_s10 = scalar_select %p857_p3, %s3484_s3, 1  ;;  %2681 = vmatprep.mubr.msk.bf16.mxu0 %vm3510_vm1, %v3509_v8  ;;  %2687 = vmatprep.mubr.msk.bf16.mxu1 %vm3510_vm1, %v3509_v8  ;;  %v4060_v11 = vcombine.low %v917_v10, %v917_v10  ;;  %v2570_v16 = vld [vmem:[#allocation8] ss:$0 sm:$0xff]  ;;  %v2571_v18 = vld [vmem:[#allocation10] ss:$0 sm:$0xff]  ;;  %v997_v22 = vsel %vm992_vm2, %v917_v10, 0 }
 0x173   : > { %s3511_s29 = smov 120   ;;  %2686 = vmatpush3.bf16.xpose.msra.mxu1 %v997_v22  ;;  %s3512_s21 = smov 112   ;;  %v2572_v23 = vld [vmem:[#allocation11] ss:$0 sm:$0xff]  ;;  %v875_v41 = vshrl.u32 %v874_v40, 7  ;;  %v4095_v42 = vand.u32 127, %v874_v40 }
 0x174   : > { %s2567_s28 = sshll.u32 %s858_s10, 3  ;;  %1107 = vrot.lane.b32.xlu1 %v4060_v11, %s3511_s29  ;;  %2697 = vmatprep.subr.bf16.mxu1 %v3509_v8  ;;  %s3513_s13 = smov 104   ;;  %vm1060_vm6 = vcmask 1043456   ;;  %vm1451_vm7 = vcmask 130048   ;;  %vm1453_vm8 = vcmask 195584   ;;  %vm2276_vm10 = vcmask 523264  }
 0x175   : > { %vm880_vm3 = vcmp.le.s32.totalorder %v4095_v42, %v875_v41  ;;  %s3515_s22 = smov 96   ;;  %s4405_s0 = smov 72  }
 0x176   : > { %s863_s25 = scalar_lea.vmem %s4449_s30, %s2567_s28  ;;  %s871_s30 = sld [smem:[#allocation3 + %s3484_s3]] }
 0x177   : > { %s4037_s5 = scalar_lea.vmem %s4450_s20, %s2567_s28  ;;  %v4039_v0 = vld [vmem:[%s863_s25] sm:$0xff]  ;;  %v3006_v9 = vld [vmem:[%s4451_s11 + $0x8] sm:$0xff]   ;;  %s4404_s25 = smov 88  }
 0x178   : > { %v889_v1 = vsel %vm888_vm0, %v4039_v0, 0.0  ;;  %v3005_v7 = vld [vmem:[%s4451_s11] sm:$0xff]   ;;  %s3517_s20 = smov 80   ;;  %s3518_s8 = smov 8  }
 0x179   : > { %890 = vadd.xlane.f32.xlu0 %v889_v1  ;;  %2678 = vmatpush3.bf16.msra.mxu0 %v3005_v7  ;;  %s4454_s28 = sld [smem:[#allocation40_spill]]  ;;  %s4406_s4 = smov 24  }
 0x17a   : > { %2679 = vmatprep.subr.bf16.mxu0 %v3509_v8  ;;  %s4455_s10 = sld [smem:[#allocation44_spill]]  ;;  %s4466_s6 = sld [smem:[#allocation50_spill]] }
 0x17b   : > { %p4467_p11 = scmp.ne.s32.totalorder %s4443_s19, 0 }
 0x17c   : > { %v881_v43 = vstv %s871_s30 }
 0x17d   : > { %2680 = vmatpush3.bf16.msra.mxu0 %v3006_v9  ;;  %vm882_vm4 = vcmp.lt.s32.totalorder %v4095_v42, %v881_v43 }
 0x17e   : > { %2691 = vmatprep.subr.bf16.mxu0 %v3509_v8  ;;  %vm4099_vm5 = vmand %vm880_vm3, %vm882_vm4 }
 0x1e6   : > { %v1108_v28 = vpop.permute.xlu1 %1107 }
 0x1e7   : > { %v1113_v32 = vsel %vm992_vm2, %v1108_v28, 0 }
 0x206   : > { %v891_v2 = vpop.xlane.xlu0 %890 }
 0x207   : > { %v893_v3 = vmul.f32 0.03125, %v891_v2 }
 0x209   : > { %v894_v4 = vsub.f32 %v4039_v0, %v893_v3 }
 0x20b   : > { %v895_v5 = vmul.f32 %v894_v4, %v894_v4 }
 0x20d   : > { %v896_v6 = vsel %vm888_vm0, %v895_v5, 0.0 }
 0x20e   : > { %897 = vadd.xlane.f32.xlu0 %v896_v6 }
 0x224   : > { %1218 = vrot.lane.b32.xlu0 %v4060_v11, %s3512_s21 }
 0x29b   : > { %v898_v12 = vpop.xlane.xlu0 %897 }
 0x29c   : > { %v899_v13 = vmul.f32 0.03125, %v898_v12 }
 0x29e   : > { %v900_v14 = vadd.f32 1e-12, %v899_v13 }
 0x29f   : > { %v1219_v33 = vpop.permute.xlu0 %1218 }
 0x2a0   : > { %3020 = vrsqrt.f32 %v900_v14  ;;  %v1224_v34 = vsel %vm992_vm2, %v1219_v33, 0 }
 0x2aa   : > { %v3021_v15 = vpop.eup %3020 }
 0x2ab   : > { %v902_v17 = vmul.f32 %v3021_v15, %v894_v4 }
 0x2ad   : > { %v909_v19 = vmul.f32 %v2570_v16, %v902_v17 }
 0x2af   : > { %v916_v20 = vadd.f32 %v2571_v18, %v909_v19 }
 0x2b1   : > { %v928_v21 = vpack.c.bf16 %v916_v20, %v916_v20 }
 0x2b3   : > { %2682 = vmatmul.mubr.msk.bf16.vlgmr.msra.gmra.mrb[0].mxu0 %vm888_vm0, %v928_v21 }
 0x2b4   : > { %2693 = vmatprep.mubr.msk.bf16.mxu0 %vm3510_vm1, %v3509_v8 }
 0x386   : > { %v984_v24 = vpop.f32.mrb[0].mxu0 }
 0x387   : > { %v985_v25 = vadd.f32 %v2572_v23, %v984_v24  ;;  %v2683_v26 = vpop.f32.mrb[1].mxu0 }
 0x388   : > { %v987_v27 = vpop.f32.mrb[2].mxu0 }
 0x389   : > { %v990_v29 = vmul.f32 0.35355338, %v985_v25  ;;  %v2684_v30 = vpop.f32.mrb[3].mxu0 }
 0x38b   : > { %v991_v31 = vpack.c.bf16 %v990_v29, %v990_v29 }
 0x38d   : > { %1105 = vrot.lane.b32.xlu1 %v991_v31, %s3511_s29  ;;  %2688 = vmatmul.mubr.msk.bf16.vlgmr.msra.gmra.mrb[0].mxu1 %vm992_vm2, %v991_v31 }
 0x38e   : > { %2698 = vmatpush3.bf16.xpose.msra.mxu1 %v1113_v32  ;;  %2699 = vmatprep.mubr.msk.bf16.mxu1 %vm3510_vm1, %v3509_v8 }
 0x38f   : > { %2709 = vmatprep.subr.bf16.mxu1 %v3509_v8 }
 0x391   : > { %1216 = vrot.lane.b32.xlu1 %v991_v31, %s3512_s21 }
 0x395   : > { %1329 = vrot.lane.b32.xlu1 %v4060_v11, %s3513_s13 }
 0x399   : > { %1327 = vrot.lane.b32.xlu1 %v991_v31, %s3513_s13 }
 0x3ff   : > { %v1106_v35 = vpop.permute.xlu1 %1105 }
 0x400   : > { %2700 = vmatmul.mubr.msk.bf16.vlgmr.msra.gmra.mrb[4].mxu1 %vm992_vm2, %v1106_v35 }
 0x401   : > { %2710 = vmatpush3.bf16.xpose.msra.mxu1 %v1224_v34  ;;  %2711 = vmatprep.mubr.msk.bf16.mxu1 %vm3510_vm1, %v3509_v8 }
 0x402   : > { %2721 = vmatprep.subr.bf16.mxu1 %v3509_v8 }
 0x403   : > { %v1217_v36 = vpop.permute.xlu1 %1216 }
 0x407   : > { %v1330_v37 = vpop.permute.xlu1 %1329 }
 0x408   : > { %v1335_v38 = vsel %vm992_vm2, %v1330_v37, 0  ;;  %2712 = vmatmul.mubr.msk.bf16.vlgmr.msra.gmra.mrb[8].mxu1 %vm992_vm2, %v1217_v36 }
 0x409   : > { %2722 = vmatpush3.bf16.xpose.msra.mxu1 %v1335_v38  ;;  %2723 = vmatprep.mubr.msk.bf16.mxu1 %vm3510_vm1, %v3509_v8 }
 0x40a   : > { %2733 = vmatprep.subr.bf16.mxu1 %v3509_v8 }
 0x40b   : > { %v1328_v39 = vpop.permute.xlu1 %1327 }
 0x410   : > { %2724 = vmatmul.mubr.msk.bf16.vlgmr.msra.gmra.mrb[12].mxu1 %vm992_vm2, %v1328_v39 }
 0x411   : > { %2737 = vmatprep.mubr.msk.bf16.mxu1 %vm3510_vm1, %v3509_v8 }
 0x460   : > { %v1033_v45 = vpop.f32.mrb[0].mxu1 }
 0x461   : > { %v1039_v46 = vsel %vm4099_vm5, %v1033_v45, -1e+30  ;;  %v2689_v47 = vpop.f32.mrb[1].mxu1 }
 0x462   : > { %v1036_v48 = vpop.f32.mrb[2].mxu1  ;;  %v1040_v49 = vsel %vm992_vm2, %v1039_v46, -inf }
 0x463   : > { %1041 = vmax.xlane.f32.xlu1 %v1040_v49  ;;  %v2690_v50 = vpop.f32.mrb[3].mxu1 }
 0x4d3   : > { %v1149_v51 = vpop.f32.mrb[4].mxu1 }
 0x4d4   : > { %v1155_v52 = vsel %vm4099_vm5, %v1149_v51, -1e+30  ;;  %v2701_v53 = vpop.f32.mrb[5].mxu1 }
 0x4d5   : > { %v1152_v54 = vpop.f32.mrb[6].mxu1  ;;  %v1156_v55 = vsel %vm992_vm2, %v1155_v52, -inf }
 0x4d6   : > { %1157 = vmax.xlane.f32.xlu0 %v1156_v55  ;;  %v2702_v56 = vpop.f32.mrb[7].mxu1 }
 0x4db   : > { %v1260_v57 = vpop.f32.mrb[8].mxu1 }
 0x4dc   : > { %v1266_v58 = vsel %vm4099_vm5, %v1260_v57, -1e+30  ;;  %v2713_v59 = vpop.f32.mrb[9].mxu1 }
 0x4dd   : > { %v1263_v60 = vpop.f32.mrb[10].mxu1  ;;  %v1267_v61 = vsel %vm992_vm2, %v1266_v58, -inf }
 0x4de   : > { %1268 = vmax.xlane.f32.xlu1 %v1267_v61  ;;  %v2714_v62 = vpop.f32.mrb[11].mxu1  ;;  %v3008_v60 = vld [vmem:[%s4454_s28] sm:$0xff]   ;;  %v3009_v61 = vld [vmem:[%s4454_s28 + $0x8] sm:$0xff]  }
 0x4df   : > { %2734 = vmatpush3.bf16.msra.mxu1 %v3008_v60 }
 0x4e0   : > { %2735 = vmatprep.subr.bf16.mxu1 %v3509_v8 }
 0x4e3   : > { %v1371_v63 = vpop.f32.mrb[12].mxu1  ;;  %2736 = vmatpush3.bf16.msra.mxu1 %v3009_v61 }
 0x4e4   : > { %v1377_v1 = vsel %vm4099_vm5, %v1371_v63, -1e+30  ;;  %v2725_v2 = vpop.f32.mrb[13].mxu1  ;;  %2749 = vmatprep.subr.bf16.mxu1 %v3509_v8 }
 0x4e5   : > { %v1374_v3 = vpop.f32.mrb[14].mxu1  ;;  %v1378_v4 = vsel %vm992_vm2, %v1377_v1, -inf }
 0x4e6   : > { %1379 = vmax.xlane.f32.xlu1 %v1378_v4  ;;  %v2726_v5 = vpop.f32.mrb[15].mxu1 }
 0x4f0   : > { %v1042_v6 = vpop.xlane.xlu1 %1041 }
 0x4f1   : > { %v1043_v7 = vsub.f32 %v1039_v46, %v1042_v6 }
 0x4f3   : > { %v1044_v9 = vmul.f32 1.442695, %v1043_v7 }
 0x4f5   : > { %3022 = vpow2.f32 %v1044_v9 }
 0x4ff   : > { %v3023_v10 = vpop.eup %3022 }
 0x500   : > { %v1046_v12 = vsel %vm992_vm2, %v3023_v10, 0.0 }
 0x501   : > { %1047 = vadd.xlane.f32.xlu0 %v1046_v12 }
 0x563   : > { %v1158_v13 = vpop.xlane.xlu0 %1157 }
 0x564   : > { %v1159_v14 = vsub.f32 %v1155_v52, %v1158_v13 }
 0x566   : > { %v1160_v15 = vmul.f32 1.442695, %v1159_v14 }
 0x568   : > { %3024 = vpow2.f32 %v1160_v15 }
 0x56b   : > { %v1269_v16 = vpop.xlane.xlu1 %1268 }
 0x56c   : > { %v1270_v17 = vsub.f32 %v1266_v58, %v1269_v16  ;;  %v2585_v16 = vld [vmem:[#allocation13] ss:$0 sm:$0xff] }
 0x56e   : > { %v1271_v18 = vmul.f32 1.442695, %v1270_v17 }
 0x570   : > { %3026 = vpow2.f32 %v1271_v18 }
 0x572   : > { %v3025_v19 = vpop.eup %3024 }
 0x573   : > { %v1162_v20 = vsel %vm992_vm2, %v3025_v19, 0.0  ;;  %v1380_v23 = vpop.xlane.xlu1 %1379 }
 0x574   : > { %1163 = vadd.xlane.f32.xlu1 %v1162_v20  ;;  %v1381_v24 = vsub.f32 %v1377_v1, %v1380_v23 }
 0x576   : > { %v1382_v25 = vmul.f32 1.442695, %v1381_v24  ;;  %v4170_v24 = vld [vmem:[%s4037_s5] sm:$0xff]   ;;  %s2621_s5 = sshll.u32 %s3484_s3, 7 }
 0x578   : > { %3028 = vpow2.f32 %v1382_v25 }
 0x57a   : > { %v3027_v21 = vpop.eup %3026 }
 0x57b   : > { %v1273_v22 = vsel %vm992_vm2, %v3027_v21, 0.0 }
 0x57c   : > { %1274 = vadd.xlane.f32.xlu0 %v1273_v22 }
 0x582   : > { %v3029_v26 = vpop.eup %3028 }
 0x583   : > { %v1384_v27 = vsel %vm992_vm2, %v3029_v26, 0.0 }
 0x585   : > { %1168 = vrot.lane.b32.xlu1 %v4060_v11, %s4404_s25  ;;  %s4465_s25 = sld [smem:[#allocation49_spill]] }
 0x58e   : > { %v1048_v28 = vpop.xlane.xlu0 %1047 }
 0x58f   : > { %3030 = vrcp.f32 %v1048_v28 }
 0x592   : > { %1055 = vrot.lane.b32.xlu0 %v4060_v11, %s3515_s22 }
 0x596   : > { %1390 = vrot.lane.b32.xlu0 %v4060_v11, %s4405_s0  ;;  %s3519_s0 = smov 16  }
 0x599   : > { %v3031_v30 = vpop.eup %3030 }
 0x59a   : > { %v1050_v32 = vmul.f32 %v3031_v30, %v3023_v10  ;;  %v3011_v30 = vld [vmem:[%s4455_s10 + $0x8] sm:$0xff]  }
 0x59c   : > { %v1051_v36 = vpack.c.bf16 %v1050_v32, %v1050_v32 }
 0x5a9   : > { %1385 = vadd.xlane.f32.xlu1 %v1384_v27 }
 0x5ba   : > { %1279 = vrot.lane.b32.xlu1 %v4060_v11, %s3517_s20 }
 0x601   : > { %v1164_v29 = vpop.xlane.xlu1 %1163 }
 0x602   : > { %3032 = vrcp.f32 %v1164_v29  ;;  %v3010_v29 = vld [vmem:[%s4455_s10] sm:$0xff]  }
 0x605   : > { %v1169_v35 = vpop.permute.xlu1 %1168 }
 0x606   : > { %v1174_v38 = vsel %vm1060_vm6, %v1169_v35, 0  ;;  %v2589_v35 = vld [vmem:[#allocation14] ss:$0 sm:$0xff] }
 0x609   : > { %v1275_v31 = vpop.xlane.xlu0 %1274 }
 0x60a   : > { %3034 = vrcp.f32 %v1275_v31 }
 0x60c   : > { %v3033_v37 = vpop.eup %3032 }
 0x60d   : > { %v1056_v33 = vpop.permute.xlu0 %1055  ;;  %v1166_v11 = vmul.f32 %v3033_v37, %v3025_v19  ;;  %v2590_v37 = vld [vmem:[#allocation16] ss:$0 sm:$0xff] }
 0x60e   : > { %v1062_v34 = vsel %vm1060_vm6, %v1056_v33, 0 }
 0x60f   : > { %2692 = vmatpush3.bf16.msra.mxu0 %v1062_v34  ;;  %v1167_v39 = vpack.c.bf16 %v1166_v11, %v1166_v11 }
 0x610   : > { %2703 = vmatprep.subr.bf16.mxu0 %v3509_v8 }
 0x611   : > { %v1391_v45 = vpop.permute.xlu0 %1390 }
 0x612   : > { %2694 = vmatmul.mubr.msk.bf16.vlgmr.msra.gmra.mrb[4].mxu0 %vm992_vm2, %v1051_v36  ;;  %v1396_v48 = vsel %vm1060_vm6, %v1391_v45, 0 }
 0x613   : > { %2704 = vmatpush3.bf16.msra.mxu0 %v1174_v38  ;;  %2705 = vmatprep.mubr.msk.bf16.mxu0 %vm3510_vm1, %v3509_v8 }
 0x614   : > { %2715 = vmatprep.subr.bf16.mxu0 %v3509_v8  ;;  %v3035_v40 = vpop.eup %3034 }
 0x615   : > { %v1277_v43 = vmul.f32 %v3035_v40, %v3027_v21  ;;  %v1632_v40 = vsel %vm992_vm2, %v4170_v24, 0 }
 0x617   : > { %v1278_v47 = vpack.c.bf16 %v1277_v43, %v1277_v43 }
 0x61a   : > { %2706 = vmatmul.mubr.msk.bf16.vlgmr.msra.gmra.mrb[8].mxu0 %vm992_vm2, %v1167_v39 }
 0x61b   : > { %2717 = vmatprep.mubr.msk.bf16.mxu0 %vm3510_vm1, %v3509_v8 }
 0x636   : > { %v1386_v41 = vpop.xlane.xlu1 %1385 }
 0x637   : > { %3036 = vrcp.f32 %v1386_v41  ;;  %v2591_v41 = vld [vmem:[#allocation17] ss:$0 sm:$0xff] }
 0x63a   : > { %v1280_v44 = vpop.permute.xlu1 %1279 }
 0x63b   : > { %v1285_v46 = vsel %vm1060_vm6, %v1280_v44, 0 }
 0x63c   : > { %2716 = vmatpush3.bf16.msra.mxu0 %v1285_v46 }
 0x63d   : > { %2727 = vmatprep.subr.bf16.mxu0 %v3509_v8 }
 0x63f   : > { %2718 = vmatmul.mubr.msk.bf16.vlgmr.msra.gmra.mrb[12].mxu0 %vm992_vm2, %v1278_v47 }
 0x640   : > { %2728 = vmatpush3.bf16.msra.mxu0 %v1396_v48  ;;  %2729 = vmatprep.mubr.msk.bf16.mxu0 %vm3510_vm1, %v3509_v8 }
 0x641   : > { %v3037_v49 = vpop.eup %3036  ;;  %2741 = vmatprep.subr.bf16.mxu0 %v3509_v8 }
 0x642   : > { %v1388_v50 = vmul.f32 %v3037_v49, %v3029_v26 }
 0x644   : > { %v1389_v51 = vpack.c.bf16 %v1388_v50, %v1388_v50 }
 0x647   : > { %2730 = vmatmul.mubr.msk.bf16.vlgmr.msra.gmra.mrb[16].mxu0 %vm992_vm2, %v1389_v51 }
 0x648   : > { %2745 = vmatprep.mubr.msk.bf16.mxu0 %vm3510_vm1, %v3509_v8  ;;  %2742 = vmatpush3.bf16.msra.mxu0 %v3010_v29 }
 0x649   : > { %2743 = vmatprep.subr.bf16.mxu0 %v3509_v8 }
 0x64c   : > { %2744 = vmatpush3.bf16.msra.mxu0 %v3011_v30 }
 0x64d   : > { %2755 = vmatprep.subr.bf16.mxu0 %v3509_v8 }
 0x6e5   : > { %v1098_v52 = vpop.f32.mrb[4].mxu0 }
 0x6e6   : > { %v2695_v53 = vpop.f32.mrb[5].mxu0 }
 0x6e7   : > { %v1101_v54 = vpop.f32.mrb[6].mxu0 }
 0x6e8   : > { %v2696_v55 = vpop.f32.mrb[7].mxu0 }
 0x6ed   : > { %v1210_v56 = vpop.f32.mrb[8].mxu0 }
 0x6ee   : > { %1439 = vrot.lane.b32.xlu1 %v1210_v56, %s3518_s8  ;;  %v2707_v57 = vpop.f32.mrb[9].mxu0 }
 0x6ef   : > { %v1213_v58 = vpop.f32.mrb[10].mxu0 }
 0x6f0   : > { %v2708_v59 = vpop.f32.mrb[11].mxu0 }
 0x712   : > { %v1321_v62 = vpop.f32.mrb[12].mxu0 }
 0x713   : > { %1443 = vrot.lane.b32.xlu0 %v1321_v62, %s3519_s0  ;;  %v2719_v63 = vpop.f32.mrb[13].mxu0 }
 0x714   : > { %v1324_v1 = vpop.f32.mrb[14].mxu0 }
 0x715   : > { %v2720_v2 = vpop.f32.mrb[15].mxu0 }
 0x71a   : > { %v1432_v3 = vpop.f32.mrb[16].mxu0 }
 0x71b   : > { %1447 = vrot.lane.b32.xlu1 %v1432_v3, %s4406_s4  ;;  %v2731_v4 = vpop.f32.mrb[17].mxu0 }
 0x71c   : > { %v1435_v5 = vpop.f32.mrb[18].mxu0 }
 0x71d   : > { %v2732_v6 = vpop.f32.mrb[19].mxu0 }
 0x760   : > { %v1440_v7 = vpop.permute.xlu1 %1439 }
 0x761   : > { %v1450_v10 = vsel %vm992_vm2, %v1098_v52, %v1440_v7 }
 0x785   : > { %v1444_v9 = vpop.permute.xlu0 %1443 }
 0x786   : > { %v1452_v12 = vsel %vm1451_vm7, %v1450_v10, %v1444_v9 }
 0x78d   : > { %v1448_v13 = vpop.permute.xlu1 %1447 }
 0x78e   : > { %v1454_v14 = vsel %vm1453_vm8, %v1452_v12, %v1448_v13 }
 0x78f   : > { %v1455_v15 = vpack.c.bf16 %v1454_v14, %v1454_v14 }
 0x791   : > { %2738 = vmatmul.mubr.msk.bf16.vlgmr.msra.gmra.mrb[16].mxu1 %vm888_vm0, %v1455_v15 }
 0x792   : > { %2751 = vmatprep.mubr.msk.bf16.mxu1 %vm3510_vm1, %v3509_v8  ;;  %2750 = vmatpush3.bf16.xpose.msra.mxu1 %v1632_v40 }
 0x793   : > { %2761 = vmatprep.subr.bf16.mxu1 %v3509_v8 }
 0x864   : > { %v1511_v17 = vpop.f32.mrb[16].mxu1 }
 0x865   : > { %v1512_v18 = vadd.f32 %v2585_v16, %v1511_v17  ;;  %v2739_v19 = vpop.f32.mrb[17].mxu1 }
 0x866   : > { %v1514_v20 = vpop.f32.mrb[18].mxu1 }
 0x867   : > { %v4165_v21 = vadd.f32 %v1512_v18, %v4039_v0  ;;  %v2740_v22 = vpop.f32.mrb[19].mxu1 }
 0x869   : > { %v1520_v23 = vsel %vm888_vm0, %v4165_v21, 0.0 }
 0x86a   : > { %1521 = vadd.xlane.f32.xlu0 %v1520_v23 }
 0x880   : > { %1736 = vrot.lane.b32.xlu0 %v4170_v24, %s3511_s29 }
 0x884   : > { %1845 = vrot.lane.b32.xlu0 %v4170_v24, %s3512_s21 }
 0x888   : > { %1954 = vrot.lane.b32.xlu0 %v4170_v24, %s3513_s13 }
 0x8f7   : > { %v1522_v25 = vpop.xlane.xlu0 %1521 }
 0x8f8   : > { %v1523_v26 = vmul.f32 0.03125, %v1522_v25 }
 0x8fa   : > { %v1524_v0 = vsub.f32 %v4165_v21, %v1523_v26 }
 0x8fb   : > { %v1737_v47 = vpop.permute.xlu0 %1736 }
 0x8fc   : > { %v1525_v27 = vmul.f32 %v1524_v0, %v1524_v0  ;;  %v1742_v51 = vsel %vm992_vm2, %v1737_v47, 0 }
 0x8fe   : > { %v1526_v28 = vsel %vm888_vm0, %v1525_v27, 0.0 }
 0x8ff   : > { %1527 = vadd.xlane.f32.xlu1 %v1526_v28  ;;  %v1846_v52 = vpop.permute.xlu0 %1845 }
 0x900   : > { %v1851_v53 = vsel %vm992_vm2, %v1846_v52, 0 }
 0x903   : > { %v1955_v55 = vpop.permute.xlu0 %1954 }
 0x904   : > { %v1960_v56 = vsel %vm992_vm2, %v1955_v55, 0 }
 0x98c   : > { %v1528_v31 = vpop.xlane.xlu1 %1527 }
 0x98d   : > { %v1529_v32 = vmul.f32 0.03125, %v1528_v31 }
 0x98f   : > { %v1530_v33 = vadd.f32 1e-12, %v1529_v32 }
 0x991   : > { %3038 = vrsqrt.f32 %v1530_v33 }
 0x99b   : > { %v3039_v34 = vpop.eup %3038 }
 0x99c   : > { %v1532_v36 = vmul.f32 %v3039_v34, %v1524_v0 }
 0x99e   : > { %v1539_v38 = vmul.f32 %v2589_v35, %v1532_v36 }
 0x9a0   : > { %v1546_v11 = vadd.f32 %v2590_v37, %v1539_v38 }
 0x9a2   : > { %v1559_v39 = vpack.c.bf16 %v1546_v11, %v1546_v11 }
 0x9a4   : > { %2746 = vmatmul.mubr.msk.bf16.vlgmr.msra.gmra.mrb[20].mxu0 %vm888_vm0, %v1559_v39 }
 0x9a5   : > { %2757 = vmatprep.mubr.msk.bf16.mxu0 %vm3510_vm1, %v3509_v8 }
 0xa77   : > { %v1615_v43 = vpop.f32.mrb[20].mxu0 }
 0xa78   : > { %v1616_v44 = vadd.f32 %v2591_v41, %v1615_v43  ;;  %v2747_v45 = vpop.f32.mrb[21].mxu0 }
 0xa79   : > { %v1618_v46 = vpop.f32.mrb[22].mxu0 }
 0xa7a   : > { %v1621_v48 = vmul.f32 0.35355338, %v1616_v44  ;;  %v2748_v49 = vpop.f32.mrb[23].mxu0 }
 0xa7c   : > { %v1622_v50 = vpack.c.bf16 %v1621_v48, %v1621_v48 }
 0xa7e   : > { %1734 = vrot.lane.b32.xlu1 %v1622_v50, %s3511_s29  ;;  %2752 = vmatmul.mubr.msk.bf16.vlgmr.msra.gmra.mrb[20].mxu1 %vm992_vm2, %v1622_v50  ;;  %s872_s29 = sld [smem:[#allocation4 + %s3484_s3]]  ;;  %s2323_s3 = scalar_lea.sflag [#allocation7], %s3999_s12 }
 0xa7f   : > { %2762 = vmatpush3.bf16.xpose.msra.mxu1 %v1742_v51  ;;  %2763 = vmatprep.mubr.msk.bf16.mxu1 %vm3510_vm1, %v3509_v8 }
 0xa80   : > { %2773 = vmatprep.subr.bf16.mxu1 %v3509_v8 }
 0xa82   : > { %1843 = vrot.lane.b32.xlu1 %v1622_v50, %s3512_s21  ;;  %s4458_s21 = smov 72  }
 0xa84   : > { %v884_v59 = vstv %s872_s29  ;;  %s4462_s29 = sld [smem:[#allocation48_spill]] }
 0xa85   : > { %vm4217_vm9 = vcmp.lt.s32.totalorder %v4095_v42, %v884_v59 }
 0xa86   : > { %1952 = vrot.lane.b32.xlu1 %v1622_v50, %s3513_s13  ;;  %s4459_s13 = smov 88  }
 0xaf0   : > { %v1735_v54 = vpop.permute.xlu1 %1734 }
 0xaf1   : > { %2764 = vmatmul.mubr.msk.bf16.vlgmr.msra.gmra.mrb[24].mxu1 %vm992_vm2, %v1735_v54 }
 0xaf2   : > { %2774 = vmatpush3.bf16.xpose.msra.mxu1 %v1851_v53  ;;  %2775 = vmatprep.mubr.msk.bf16.mxu1 %vm3510_vm1, %v3509_v8 }
 0xaf3   : > { %2785 = vmatprep.subr.bf16.mxu1 %v3509_v8 }
 0xaf4   : > { %v1844_v57 = vpop.permute.xlu1 %1843 }
 0xaf8   : > { %v1953_v58 = vpop.permute.xlu1 %1952 }
 0xaf9   : > { %2776 = vmatmul.mubr.msk.bf16.vlgmr.msra.gmra.mrb[28].mxu1 %vm992_vm2, %v1844_v57 }
 0xafa   : > { %2786 = vmatpush3.bf16.xpose.msra.mxu1 %v1960_v56  ;;  %2787 = vmatprep.mubr.msk.bf16.mxu1 %vm3510_vm1, %v3509_v8 }
 0xafb   : > { %2797 = vmatprep.subr.bf16.mxu1 %v3509_v8 }
 0xb01   : > { %2788 = vmatmul.mubr.msk.bf16.vlgmr.msra.gmra.mrb[32].mxu1 %vm992_vm2, %v1953_v58 }
 0xb02   : > { %2801 = vmatprep.mubr.msk.bf16.mxu1 %vm3510_vm1, %v3509_v8 }
 0xb51   : > { %v1668_v61 = vpop.f32.mrb[20].mxu1 }
 0xb52   : > { %v1674_v62 = vsel %vm4217_vm9, %v1668_v61, -1e+30  ;;  %v2753_v63 = vpop.f32.mrb[21].mxu1 }
 0xb53   : > { %v1671_v1 = vpop.f32.mrb[22].mxu1  ;;  %v1675_v2 = vsel %vm1451_vm7, %v1674_v62, -inf }
 0xb54   : > { %1676 = vmax.xlane.f32.xlu0 %v1675_v2  ;;  %v2754_v3 = vpop.f32.mrb[23].mxu1 }
 0xbc4   : > { %v1778_v4 = vpop.f32.mrb[24].mxu1 }
 0xbc5   : > { %v1784_v5 = vsel %vm4217_vm9, %v1778_v4, -1e+30  ;;  %v2765_v6 = vpop.f32.mrb[25].mxu1  ;;  %v3012_v4 = vld [vmem:[#allocation19] sm:$0xff]  }
 0xbc6   : > { %v1781_v7 = vpop.f32.mrb[26].mxu1  ;;  %v1785_v42 = vsel %vm1451_vm7, %v1784_v5, -inf  ;;  %2798 = vmatpush3.bf16.msra.mxu1 %v3012_v4 }
 0xbc7   : > { %1786 = vmax.xlane.f32.xlu1 %v1785_v42  ;;  %v2766_v9 = vpop.f32.mrb[27].mxu1  ;;  %2799 = vmatprep.subr.bf16.mxu1 %v3509_v8  ;;  %v3013_v42 = vld [vmem:[#allocation19 + $0x8] sm:$0xff]  }
 0xbca   : > { %2800 = vmatpush3.bf16.msra.mxu1 %v3013_v42 }
 0xbcb   : > { %2813 = vmatprep.subr.bf16.mxu1 %v3509_v8 }
 0xbcc   : > { %v1887_v10 = vpop.f32.mrb[28].mxu1 }
 0xbcd   : > { %v1893_v12 = vsel %vm4217_vm9, %v1887_v10, -1e+30  ;;  %v2777_v13 = vpop.f32.mrb[29].mxu1 }
 0xbce   : > { %v1890_v14 = vpop.f32.mrb[30].mxu1  ;;  %v1894_v15 = vsel %vm1451_vm7, %v1893_v12, -inf }
 0xbcf   : > { %1895 = vmax.xlane.f32.xlu0 %v1894_v15  ;;  %v2778_v16 = vpop.f32.mrb[31].mxu1 }
 0xbd4   : > { %v1996_v17 = vpop.f32.mrb[32].mxu1 }
 0xbd5   : > { %v2002_v18 = vsel %vm4217_vm9, %v1996_v17, -1e+30  ;;  %v2789_v19 = vpop.f32.mrb[33].mxu1 }
 0xbd6   : > { %v1999_v20 = vpop.f32.mrb[34].mxu1  ;;  %v2003_v22 = vsel %vm1451_vm7, %v2002_v18, -inf }
 0xbd7   : > { %2004 = vmax.xlane.f32.xlu0 %v2003_v22  ;;  %v2790_v23 = vpop.f32.mrb[35].mxu1 }
 0xbe1   : > { %v1677_v25 = vpop.xlane.xlu0 %1676 }
 0xbe2   : > { %v1678_v26 = vsub.f32 %v1674_v62, %v1677_v25 }
 0xbe4   : > { %v1679_v0 = vmul.f32 1.442695, %v1678_v26 }
 0xbe6   : > { %3040 = vpow2.f32 %v1679_v0 }
 0xbf0   : > { %v3041_v27 = vpop.eup %3040 }
 0xbf1   : > { %v1681_v28 = vsel %vm1451_vm7, %v3041_v27, 0.0 }
 0xbf2   : > { %1682 = vadd.xlane.f32.xlu1 %v1681_v28 }
 0xc03   : > { %1687 = vrot.lane.b32.xlu1 %v4170_v24, %s3515_s22  ;;  %s4460_s22 = smov 24  }
 0xc54   : > { %v1787_v29 = vpop.xlane.xlu1 %1786 }
 0xc55   : > { %v1788_v30 = vsub.f32 %v1784_v5, %v1787_v29 }
 0xc57   : > { %v1789_v31 = vmul.f32 1.442695, %v1788_v30 }
 0xc59   : > { %3042 = vpow2.f32 %v1789_v31 }
 0xc5c   : > { %v1896_v32 = vpop.xlane.xlu0 %1895 }
 0xc5d   : > { %v1897_v33 = vsub.f32 %v1893_v12, %v1896_v32 }
 0xc5f   : > { %v1898_v34 = vmul.f32 1.442695, %v1897_v33 }
 0xc61   : > { %3044 = vpow2.f32 %v1898_v34 }
 0xc63   : > { %v3043_v35 = vpop.eup %3042 }
 0xc64   : > { %v2005_v36 = vpop.xlane.xlu0 %2004  ;;  %v1791_v37 = vsel %vm1451_vm7, %v3043_v35, 0.0 }
 0xc65   : > { %v2006_v38 = vsub.f32 %v2002_v18, %v2005_v36  ;;  %1792 = vadd.xlane.f32.xlu0 %v1791_v37 }
 0xc67   : > { %v2007_v11 = vmul.f32 1.442695, %v2006_v38 }
 0xc69   : > { %3046 = vpow2.f32 %v2007_v11 }
 0xc6b   : > { %v3045_v39 = vpop.eup %3044 }
 0xc6c   : > { %v1900_v40 = vsel %vm1451_vm7, %v3045_v39, 0.0 }
 0xc6d   : > { %1901 = vadd.xlane.f32.xlu1 %v1900_v40  ;;  %v3016_v40 = vld [vmem:[%s4462_s29] sm:$0xff]  }
 0xc73   : > { %v3047_v41 = vpop.eup %3046 }
 0xc74   : > { %v2009_v43 = vsel %vm1451_vm7, %v3047_v41, 0.0 }
 0xc75   : > { %2010 = vadd.xlane.f32.xlu0 %v2009_v43 }
 0xc7e   : > { %1906 = vrot.lane.b32.xlu1 %v4170_v24, %s3517_s20  ;;  %s4463_s20 = sld [smem:[#allocation45_spill]] }
 0xc7f   : > { %v1683_v44 = vpop.xlane.xlu1 %1682 }
 0xc80   : > { %3048 = vrcp.f32 %v1683_v44 }
 0xc82   : > { %2015 = vrot.lane.b32.xlu1 %v4170_v24, %s4458_s21 }
 0xc83   : > { %v1688_v45 = vpop.permute.xlu1 %1687 }
 0xc84   : > { %2756 = vmatpush3.bf16.msra.mxu0 %v1688_v45 }
 0xc85   : > { %2767 = vmatprep.subr.bf16.mxu0 %v3509_v8 }
 0xc8a   : > { %v3049_v46 = vpop.eup %3048 }
 0xc8b   : > { %v1685_v47 = vmul.f32 %v3049_v46, %v3041_v27  ;;  %1797 = vrot.lane.b32.xlu0 %v4170_v24, %s4459_s13  ;;  %v2604_v27 = vld [vmem:[#allocation20] ss:$0 sm:$0xff] }
 0xc8d   : > { %v1686_v48 = vpack.c.bf16 %v1685_v47, %v1685_v47  ;;  %v2608_v47 = vld [vmem:[#allocation22] ss:$0 sm:$0xff] }
 0xc8f   : > { %2758 = vmatmul.mubr.msk.bf16.vlgmr.msra.gmra.mrb[24].mxu0 %vm1451_vm7, %v1686_v48 }
 0xc90   : > { %2769 = vmatprep.mubr.msk.bf16.mxu0 %vm3510_vm1, %v3509_v8 }
 0xcf2   : > { %v1793_v49 = vpop.xlane.xlu0 %1792 }
 0xcf3   : > { %3050 = vrcp.f32 %v1793_v49  ;;  %v2609_v49 = vld [vmem:[%s4463_s20] ss:$0 sm:$0xff]  ;;  %s3521_s20 = smov [#allocation23]  }
 0xcf4   : > { %s3392_s4 = sshll.u32 %s3521_s20, 4  ;;  %s3393_s4 = int_to_ptr.vmem [resolvable:$false] %s3392_s4 }
 0xcfa   : > { %v1902_v50 = vpop.xlane.xlu1 %1901 }
 0xcfb   : > { %3052 = vrcp.f32 %v1902_v50 }
 0xcfd   : > { %v3051_v51 = vpop.eup %3050 }
 0xcfe   : > { %v1795_v53 = vmul.f32 %v3051_v51, %v3043_v35  ;;  %v1907_v56 = vpop.permute.xlu1 %1906 }
 0xd00   : > { %v1796_v55 = vpack.c.bf16 %v1795_v53, %v1795_v53  ;;  %v3018_v53 = vld [vmem:[%s4462_s29 + $0x10] sm:$0xff]  }
 0xd02   : > { %v2011_v52 = vpop.xlane.xlu0 %2010  ;;  %v2016_v59 = vpop.permute.xlu1 %2015 }
 0xd03   : > { %3054 = vrcp.f32 %v2011_v52 }
 0xd05   : > { %v3053_v24 = vpop.eup %3052 }
 0xd06   : > { %v1798_v54 = vpop.permute.xlu0 %1797  ;;  %v1904_v57 = vmul.f32 %v3053_v24, %v3045_v39 }
 0xd07   : > { %2768 = vmatpush3.bf16.msra.mxu0 %v1798_v54  ;;  %v3019_v54 = vld [vmem:[%s4462_s29 + $0x18] sm:$0xff]  }
 0xd08   : > { %2779 = vmatprep.subr.bf16.mxu0 %v3509_v8  ;;  %v1905_v58 = vpack.c.bf16 %v1904_v57, %v1904_v57 }
 0xd0a   : > { %2770 = vmatmul.mubr.msk.bf16.vlgmr.msra.gmra.mrb[28].mxu0 %vm1451_vm7, %v1796_v55 }
 0xd0b   : > { %2780 = vmatpush3.bf16.msra.mxu0 %v1907_v56  ;;  %2781 = vmatprep.mubr.msk.bf16.mxu0 %vm3510_vm1, %v3509_v8 }
 0xd0c   : > { %2791 = vmatprep.subr.bf16.mxu0 %v3509_v8 }
 0xd0d   : > { %v3055_v60 = vpop.eup %3054 }
 0xd0e   : > { %v2013_v61 = vmul.f32 %v3055_v60, %v3047_v41  ;;  %v3017_v41 = vld [vmem:[%s4462_s29 + $0x8] sm:$0xff]  }
 0xd10   : > { %v2014_v62 = vpack.c.bf16 %v2013_v61, %v2013_v61 }
 0xd12   : > { %2782 = vmatmul.mubr.msk.bf16.vlgmr.msra.gmra.mrb[32].mxu0 %vm1451_vm7, %v1905_v58 }
 0xd13   : > { %2792 = vmatpush3.bf16.msra.mxu0 %v2016_v59  ;;  %2793 = vmatprep.mubr.msk.bf16.mxu0 %vm3510_vm1, %v3509_v8 }
 0xd14   : > { %2805 = vmatprep.subr.bf16.mxu0 %v3509_v8 }
 0xd1a   : > { %2794 = vmatmul.mubr.msk.bf16.vlgmr.msra.gmra.mrb[36].mxu0 %vm1451_vm7, %v2014_v62 }
 0xd1b   : > { %2809 = vmatprep.mubr.msk.bf16.mxu0 %vm3510_vm1, %v3509_v8 }
 0xd62   : > { %v1727_v63 = vpop.f32.mrb[24].mxu0 }
 0xd63   : > { %v2759_v1 = vpop.f32.mrb[25].mxu0 }
 0xd64   : > { %v1730_v2 = vpop.f32.mrb[26].mxu0 }
 0xd65   : > { %v2760_v3 = vpop.f32.mrb[27].mxu0 }
 0xddd   : > { %v1837_v5 = vpop.f32.mrb[28].mxu0 }
 0xdde   : > { %2062 = vrot.lane.b32.xlu0 %v1837_v5, %s3518_s8  ;;  %v2771_v6 = vpop.f32.mrb[29].mxu0  ;;  %s4461_s8 = sld [smem:[#allocation46_spill]] }
 0xddf   : > { %v1840_v7 = vpop.f32.mrb[30].mxu0 }
 0xde0   : > { %v2772_v9 = vpop.f32.mrb[31].mxu0 }
 0xde4   : > { %v3014_v39 = vld [vmem:[%s4461_s8] sm:$0xff]  }
 0xde5   : > { %v1946_v10 = vpop.f32.mrb[32].mxu0  ;;  %2806 = vmatpush3.bf16.msra.mxu0 %v3014_v39 }
 0xde6   : > { %2066 = vrot.lane.b32.xlu1 %v1946_v10, %s3519_s0  ;;  %v2783_v12 = vpop.f32.mrb[33].mxu0  ;;  %2807 = vmatprep.subr.bf16.mxu0 %v3509_v8  ;;  %s2566_s0 = sshll.u32 %s3999_s12, 3 }
 0xde7   : > { %v1949_v13 = vpop.f32.mrb[34].mxu0  ;;  %s856_s30 = scalar_lea.vmem [#allocation23], %s2566_s0 }
 0xde8   : > { %v2784_v14 = vpop.f32.mrb[35].mxu0  ;;  %s2337_s21 = sshll.u32 %s856_s30, 4  ;;  %s4314_s21 = int_to_ptr.vmem [resolvable:$true] %s2337_s21 }
 0xde9   : > { %s3388_s0 = scalar_lea.vmem %s4314_s21, 128  ;;  %p3395_p5 = scmp.lt.s32.totalorder %s4314_s21, %s3393_s4 }
 0xdea   : > { %p3389_p6 = scmp.ne.s32.totalorder %s4314_s21, %s3388_s0 }
 0xdec   : > { %p3390_p13 = pnand %p3389_p6, %p4467_p11 }
 0xded   : > { %v2055_v15 = vpop.f32.mrb[36].mxu0 }
 0xdee   : > { %2070 = vrot.lane.b32.xlu0 %v2055_v15, %s4460_s22  ;;  %v2795_v16 = vpop.f32.mrb[37].mxu0  ;;  %s4464_s22 = sld [smem:[#allocation47_spill]]  ;;  %p3391_p2 = pneg %p3390_p13 }
 0xdef   : > { %v2058_v17 = vpop.f32.mrb[38].mxu0 }
 0xdf0   : > { %v2796_v18 = vpop.f32.mrb[39].mxu0 }
 0xdf4   : > { %v2610_v55 = vld [vmem:[%s4464_s22] ss:$0 sm:$0xff] }
 0xe50   : > { %v2063_v19 = vpop.permute.xlu0 %2062 }
 0xe51   : > { %v2073_v22 = vsel %vm992_vm2, %v1727_v63, %v2063_v19 }
 0xe58   : > { %v2067_v20 = vpop.permute.xlu1 %2066 }
 0xe59   : > { %v2074_v23 = vsel %vm1451_vm7, %v2073_v22, %v2067_v20 }
 0xe60   : > { %v2071_v25 = vpop.permute.xlu0 %2070 }
 0xe61   : > { %v2075_v26 = vsel %vm1453_vm8, %v2074_v23, %v2071_v25 }
 0xe62   : > { %v2076_v0 = vpack.c.bf16 %v2075_v26, %v2075_v26 }
 0xe64   : > { %2802 = vmatmul.mubr.msk.bf16.vlgmr.msra.gmra.mrb[36].mxu1 %vm888_vm0, %v2076_v0 }
 0xe65   : > { %2821 = vmatprep.mubr.msk.bf16.mxu1 %vm3510_vm1, %v3509_v8  ;;  %2814 = vmatpush3.bf16.msra.mxu1 %v3016_v40 }
 0xe66   : > { %2815 = vmatprep.subr.bf16.mxu1 %v3509_v8 }
 0xe69   : > { %2816 = vmatpush3.bf16.msra.mxu1 %v3017_v41 }
 0xe6a   : > { %2817 = vmatprep.subr.bf16.mxu1 %v3509_v8 }
 0xe6d   : > { %2818 = vmatpush3.bf16.msra.mxu1 %v3018_v53 }
 0xe6e   : > { %2819 = vmatprep.subr.bf16.mxu1 %v3509_v8  ;;  %v2614_v8 = vld [vmem:[%s4465_s25] ss:$0 sm:$0xff]  ;;  %s3394_s25 = scalar_lea.vmem %s3393_s4, 256 }
 0xe6f   : > { %p3396_p8 = scmp.lt.s32.totalorder %s3394_s25, %s3388_s0 }
 0xe71   : > { %2820 = vmatpush3.bf16.msra.mxu1 %v3019_v54  ;;  %p3397_p0 = por %p3396_p8, %p3395_p5 }
 0xe73   : > { %p3398_p1 = pnand %p3397_p0, %p3391_p2 }
 0xf37   : > { %v2132_v28 = vpop.f32.mrb[36].mxu1 }
 0xf38   : > { %v2133_v29 = vadd.f32 %v2604_v27, %v2132_v28  ;;  %v2803_v30 = vpop.f32.mrb[37].mxu1 }
 0xf39   : > { %v2135_v31 = vpop.f32.mrb[38].mxu1 }
 0xf3a   : > { %v2138_v32 = vadd.f32 %v2133_v29, %v4165_v21  ;;  %v2804_v33 = vpop.f32.mrb[39].mxu1  ;;  %v3015_v21 = vld [vmem:[%s4461_s8 + $0x8] sm:$0xff]   ;;  %s4312_s8 = scalar_lea.hbm %s4466_s6, %s2621_s5 }
 0xf3b   : > { %2808 = vmatpush3.bf16.msra.mxu0 %v3015_v21 }
 0xf3c   : > { %v2141_v34 = vsel %vm888_vm0, %v2138_v32, 0.0 }
 0xf3d   : > { %2142 = vadd.xlane.f32.xlu1 %v2141_v34 }
 0xfca   : > { %v2143_v35 = vpop.xlane.xlu1 %2142 }
 0xfcb   : > { %v2144_v36 = vmul.f32 0.03125, %v2143_v35 }
 0xfcd   : > { %v2145_v37 = vsub.f32 %v2138_v32, %v2144_v36 }
 0xfcf   : > { %v2146_v38 = vmul.f32 %v2145_v37, %v2145_v37 }
 0xfd1   : > { %v2147_v11 = vsel %vm888_vm0, %v2146_v38, 0.0 }
 0xfd2   : > { %2148 = vadd.xlane.f32.xlu0 %v2147_v11 }
0x105f   : > { %v2149_v43 = vpop.xlane.xlu0 %2148 }
0x1060   : > { %v2150_v44 = vmul.f32 0.03125, %v2149_v43 }
0x1062   : > { %v2151_v45 = vadd.f32 1e-12, %v2150_v44 }
0x1064   : > { %3056 = vrsqrt.f32 %v2151_v45 }
0x106e   : > { %v3057_v46 = vpop.eup %3056 }
0x106f   : > { %v2153_v48 = vmul.f32 %v3057_v46, %v2145_v37 }
0x1071   : > { %v2160_v50 = vmul.f32 %v2608_v47, %v2153_v48 }
0x1073   : > { %v2167_v51 = vadd.f32 %v2609_v49, %v2160_v50 }
0x1075   : > { %v2168_v52 = vpack.c.bf16 %v2167_v51, %v2167_v51 }
0x1077   : > { %2810 = vmatmul.mubr.msk.bf16.vlgmr.msra.gmra.mrb[40].mxu0 %vm888_vm0, %v2168_v52 }
0x114a   : > { %v2229_v56 = vpop.f32.mrb[40].mxu0 }
0x114b   : > { %v2230_v24 = vadd.f32 %v2610_v55, %v2229_v56  ;;  %v2811_v57 = vpop.f32.mrb[41].mxu0 }
0x114c   : > { %v2232_v58 = vpop.f32.mrb[42].mxu0 }
0x114d   : > { %v2235_v59 = vmax.f32 %v2230_v24, 0.0  ;;  %v2812_v60 = vpop.f32.mrb[43].mxu0 }
0x114f   : > { %v2236_v61 = vpack.c.bf16 %v2235_v59, %v2235_v59 }
0x1151   : > { %2822 = vmatmul.mubr.msk.bf16.vlgmr.msra.gmra.mrb[40].mxu1 %vm2276_vm10, %v2236_v61 }
0x1224   : > { %v2314_v62 = vpop.f32.mrb[40].mxu1 }
0x1225   : > { %v2315_v63 = vadd.f32 %v2614_v8, %v2314_v62  ;;  %v2823_v1 = vpop.f32.mrb[41].mxu1 }
0x1226   : > { %v2317_v2 = vpop.f32.mrb[42].mxu1 }
0x1227   : > { %v2320_v3 = vadd.f32 %v2315_v63, %v2138_v32  ;;  %v2824_v4 = vpop.f32.mrb[43].mxu1 }
0x1229   : > { %2321 = vst.msk [vmem:[%s856_s30] sm:$0xff] %vm888_vm0, %v2320_v3 }
0x122a   : > { %3401 = shalt.err (!%p3398_p1)
}
0x122b   : > { %s3402_s12 = scalar_lea.hbm %s4312_s8, 128  ;;  %s3406_s13 = scalar_lea.hbm %s4466_s6, 256 }
0x122c   : > { %p3403_p10 = scmp.ne.s32.totalorder %s4312_s8, %s3402_s12  ;;  %p3407_p7 = scmp.lt.u32.totalorder %s4312_s8, %s4466_s6 }
0x122d   : > { %p3408_p4 = scmp.lt.u32.totalorder %s3406_s13, %s3402_s12  ;;  %p3410_p6 = scmp.lt.u32.totalorder %s3402_s12, %s4312_s8 }
0x122e   : > { %p3404_p12 = pnand %p3403_p10, %p4467_p11 }
0x122f   : > { %p3409_p3 = por %p3408_p4, %p3407_p7 }
0x1230   : > { %p3405_p9 = pneg %p3404_p12 }
0x1231   : > { %p3411_p13 = por %p3410_p6, %p3409_p3 }
0x1233   : > { %p3412_p2 = pnand %p3411_p13, %p3405_p9 }
0x1235   : > { %3415 = shalt.err (!%p3412_p2)
}
0x1236   : > { %2867 = dma.vmem_to_hbm [thread:$0]  (%p4467_p11), %s4314_s21, 128, %s4312_s8, %s2323_s3  }
0x1237 PF: > { %s2349_s0 = sand.u32 1, %s3472_s24   ;;  %p4468_p5 = scmp.ne.s32.totalorder %s4444_s18, 0 }
0x1238   : > { %p4469_p8 = scmp.ge.s32.totalorder %s3492_s7, 2  ;;  %s2350_s4 = scalar_lea.sflag [#allocation7], %s2349_s0 }
0x123a   : > { %p2905_p0 = pnand %p4469_p8, %p4468_p5 }
0x123c   : > { %3467 = dma.done.wait (!%p2905_p0), %s2350_s4, 128  }
0x123d   : > { %3469 = vsyncadd (!%p2905_p0), %s2350_s4, 4294967168  ;;  %s50_s7 = sadd.s32 1, %s3492_s7   ;;  %s4470_s24 = smov %s3476_s2 }
0x123e   : > { %p47_p1 = scmp.ge.s32.totalorder %s50_s7, 4   ;;  %s4471_s2 = smov %s3480_s26 }
0x123f   : > { %s4472_s26 = smov %s3949_s23  ;;  %s4473_s3 = smov %s3488_s1 }
0x1240   : > { %s4474_s1 = smov %s4476_s9  ;;  %49 = sbr.rel (!%p47_p1) target bundleno = 44 (0x2c), region = 195 }
0x1247   :  { %2355 = vsyncpa [#allocation6], 1 }
0x1248   :  { %2357 = vsyncpa [#allocation6 + $0x1], 1 }
0x1249   :  { %2358 = vsyncpa [#allocation9], 1 }
0x124a   :  { %2359 = vsyncpa [#allocation12], 1 }
0x124b   :  { %2360 = vsyncpa [#allocation15], 1 }
0x124c   :  { %2361 = vsyncpa [#allocation18], 1 }
0x124d   :  { %2362 = vsyncpa [#allocation21], 1 }
0x124e   :  { %2363 = vsyncpa [#allocation7], 1 }
0x124f   :  { %2365 = vsyncpa [#allocation7 + $0x1], 1 }

</bundles_post_ra>
